<compile_context>
chip_gen: v7x
topology: tpu7x:2x2x1
jax: 0.10.0
libtpu: 0.0.40
codegen_flags: <defaults>
</compile_context>

<pallas_src>
import jax
import jax.numpy as jnp
from jax import lax
from jax.experimental import pallas as pl
from jax.experimental.pallas import tpu as pltpu

N_SHARED_ITERS = 50  # the `* 50` shared Sequential(Linear(no bias), ReLU) block
_LANE = 128
_SUBLANE = 8


def _round_up(x, m):
    return -(-x // m) * m


def _pick_num_chunks(B, N):
    # Dual-TensorCore chips (v7x): split the merged edge slab into two
    # "parallel" grid steps whenever the per-chunk edge count stays 128-lane
    # aligned; out_cols < 128 only costs a masked output store.
    kind = ""
    try:
        kind = jax.devices()[0].device_kind.lower()
    except Exception:
        pass
    if ("v7" in kind or "7x" in kind) and B % 2 == 0 and ((B // 2) * N * N) % _LANE == 0:
        return 2
    return 1


def _chain_split(cols, max_chains):
    """Split the edge-column axis into K independent, 128-lane-aligned chains."""
    if max_chains <= 1 or cols % _LANE != 0:
        return 1, cols
    tiles = cols // _LANE
    k = min(max_chains, tiles)
    while tiles % k:
        k -= 1
    return k, (tiles // k) * _LANE


def _pack_constants(entries, width):
    """Pack (name, 2D array) pairs into one zero-padded (rows, width) f32 slab.

    Returns (slab, offsets) with offsets[name] = (row_start, nrows, ncols).
    Each block starts on a sublane (8-row) boundary so static slices stay
    tile-aligned.
    """
    offsets = {}
    blocks = []
    row = 0
    for name, arr in entries:
        a = jnp.asarray(arr, jnp.float32)
        nr, nc = a.shape
        nr_pad = _round_up(nr, _SUBLANE)
        blk = jnp.zeros((nr_pad, width), jnp.float32).at[:nr, :nc].set(a)
        offsets[name] = (row, nr, nc)
        blocks.append(blk)
        row += nr_pad
    return jnp.concatenate(blocks, axis=0), offsets


def _build_kernel(offsets, growth_names, *, N, nf, mf, cols, out_cols,
                  n_chains, chain_lanes):
    """cols = edges per grid step (lane axis); out_cols = batch_chunk * N."""
    f32 = jnp.float32
    ocp = max(_LANE, _round_up(out_cols, _LANE))   # padded lane width of j-sum result

    def sl(pack_ref, name):
        r0, nr, nc = offsets[name]
        blk = pack_ref[pl.ds(r0, nr), :]           # full-lane load (zero padded)
        return blk[:, :nc] if nc != blk.shape[1] else blk

    def kernel(bfm_ref, afm_ref, idx_ref, pack_ref, out_ref):
        # ---- edge_map MLP, transposed layout: activations are (hidden, cols) ----
        h = bfm_ref[...]                                            # (ef, cols)
        for wname, bname in growth_names:                           # growth Linear+ReLU
            w = sl(pack_ref, wname)                                 # (dout, din)
            b = sl(pack_ref, bname)                                 # (dout, 1) -> lane bcast
            h = jnp.maximum(
                jnp.dot(w, h, preferred_element_type=f32) + b, 0.0)

        ws = sl(pack_ref, "WsT")                                    # (hid, hid), loaded once
        # 50x shared Linear(no bias)+ReLU, fully unrolled.  Split into n_chains
        # independent lane-column chains so the MXU pipeline stays filled.
        if n_chains == 1:
            chains = [h]
        else:
            chains = [h[:, k * chain_lanes:(k + 1) * chain_lanes]
                      for k in range(n_chains)]
        for _ in range(N_SHARED_ITERS):
            chains = [jnp.maximum(jnp.dot(ws, c, preferred_element_type=f32), 0.0)
                      for c in chains]
        h = chains[0] if n_chains == 1 else jnp.concatenate(chains, axis=1)

        wl = sl(pack_ref, "WlT")                                    # (mf*nf, hid)
        bl = sl(pack_ref, "blT")                                    # (mf*nf, 1)
        e = jnp.dot(wl, h, preferred_element_type=f32) + bl         # (mf*nf, cols)

        # ---- contraction against afm: one-hot gather / reduce matrices built
        #      in-kernel from iota compares (nothing O(cols)-wide from HBM) ----
        src = idx_ref[0:1, :]                       # (1, cols): b_loc*N + j per edge column
        own = idx_ref[1:2, :]                       # (1, cols): b_loc*N + i per edge column

        ksel = lax.broadcasted_iota(jnp.int32, (out_cols, cols), 0).astype(f32)
        sel = jnp.where(ksel == src, 1.0, 0.0)                      # (out_cols, cols) one-hot
        abar = jnp.dot(afm_ref[...], sel,
                       preferred_element_type=f32)                  # (nf, cols): afm[b, j, :]

        ttile = sl(pack_ref, "Ttile")                               # (mf*nf, nf) 0/1
        a_til = jnp.dot(ttile, abar, preferred_element_type=f32)    # (mf*nf, cols)

        gt = sl(pack_ref, "GT")                                     # (mf, mf*nf) 0/1
        t = jnp.dot(gt, e * a_til,
                    preferred_element_type=f32)                     # (mf, cols)   sum over n

        kred = lax.broadcasted_iota(jnp.int32, (ocp, cols), 0).astype(f32)
        red = jnp.where(kred == own, 1.0, 0.0)                      # (ocp, cols) one-hot
        # NT-form contraction over the shared lane axis: sum over j per (b, i).
        msg = lax.dot_general(t, red, (((1,), (1,)), ((), ())),
                              preferred_element_type=f32)           # (mf, ocp)

        mb = sl(pack_ref, "mbias")                                  # (mf, 1) -> lane bcast
        out_ref[...] = (msg[:, :out_cols] + mb).astype(out_ref.dtype)

    return kernel


def edge_network_pallas(afm, bfm, params, *, num_chunks=None, max_chains=4):
    B, N, nf = afm.shape
    ef = bfm.shape[-1]
    mf = params["mf"]
    growth = params["growth"]

    if num_chunks is None:
        num_chunks = _pick_num_chunks(B, N)
    if num_chunks > 1 and ((B % num_chunks) or (((B // num_chunks) * N * N) % _LANE)):
        num_chunks = 1
    Bc = B // num_chunks
    cols = Bc * N * N            # edges per grid step (lane axis)
    out_cols = Bc * N            # output columns per grid step
    n_chains, chain_lanes = _chain_split(cols, max_chains)

    # ---- layout plumbing (transposes / flattens only, no arithmetic) ----
    # TODO(synk): the bfm transpose is an extra HBM pass of the biggest input at
    # scale; feeding natural (B*N*N, ef) + an in-kernel relayout would remove it.
    bfm_t = bfm.reshape(B * N * N, ef).T.astype(jnp.float32)     # (ef, B*N*N)
    afm_t = afm.reshape(B * N, nf).T.astype(jnp.float32)         # (nf, B*N)

    # Per-edge-column integer tags (chunk-local): row 0 = b_loc*N + j (source
    # node column in afm), row 1 = b_loc*N + i (destination output column).
    b_loc = (jnp.arange(B, dtype=jnp.int32) % Bc)[:, None, None]
    j_ids = jnp.arange(N, dtype=jnp.int32)[None, None, :]
    i_ids = jnp.arange(N, dtype=jnp.int32)[None, :, None]
    src = jnp.broadcast_to(b_loc * N + j_ids, (B, N, N)).reshape(1, B * N * N)
    own = jnp.broadcast_to(b_loc * N + i_ids, (B, N, N)).reshape(1, B * N * N)
    idx_rows = jnp.concatenate([src, own], axis=0).astype(jnp.float32)   # (2, B*N*N)

    # ---- constant pack: learned params + tiny fixed 0/1 group matrices only ----
    ttile = jnp.tile(jnp.eye(nf, dtype=jnp.float32), (mf, 1))        # (mf*nf, nf)
    gt = jnp.repeat(jnp.eye(mf, dtype=jnp.float32), nf, axis=1)      # (mf, mf*nf)
    entries = []
    growth_names = []
    for li, (W, b) in enumerate(growth):
        wn, bn = f"Wg{li}", f"bg{li}"
        entries.append((wn, W.T))                                    # (dout, din)
        entries.append((bn, b.reshape(-1, 1)))                       # (dout, 1)
        growth_names.append((wn, bn))
    entries += [
        ("WsT", params["Ws"].T),
        ("WlT", params["Wl"].T),
        ("blT", params["bl"].reshape(-1, 1)),
        ("Ttile", ttile),
        ("GT", gt),
        ("mbias", params["mbias"].reshape(-1, 1)),
    ]
    width = max(_LANE, _round_up(max(a.shape[1] for _, a in entries), _LANE))
    pack, offsets = _pack_constants(entries, width)

    kernel = _build_kernel(offsets, growth_names, N=N, nf=nf, mf=mf,
                           cols=cols, out_cols=out_cols,
                           n_chains=n_chains, chain_lanes=chain_lanes)

    out_t = pl.pallas_call(
        kernel,
        out_shape=jax.ShapeDtypeStruct((mf, B * N), jnp.float32),
        grid_spec=pltpu.PrefetchScalarGridSpec(
            num_scalar_prefetch=0,
            grid=(num_chunks,),
            in_specs=[
                pl.BlockSpec((ef, cols), lambda c: (0, c)),          # edge features (transposed)
                pl.BlockSpec((nf, out_cols), lambda c: (0, c)),      # node features (transposed)
                pl.BlockSpec((2, cols), lambda c: (0, c)),           # per-edge column tags
                pl.BlockSpec(pack.shape, lambda c: (0, 0)),          # packed learned constants
            ],
            out_specs=pl.BlockSpec((mf, out_cols), lambda c: (0, c)),
        ),
        compiler_params=pltpu.CompilerParams(
            dimension_semantics=("parallel",)),
    )(bfm_t, afm_t, idx_rows, pack)

    # (mf, B*N) -> (B, N, mf): tiny wrapper-side relayout only.
    return out_t.T.reshape(B, N, mf)


def init_params(key, nf, ef, mf):
    """Deterministic synthetic parameters matching EdgeNetwork.__init__ shapes."""
    dims = []
    in_layer = ef
    while in_layer ** 2 < nf * mf:
        dims.append((in_layer, in_layer ** 2))
        in_layer = in_layer ** 2
    keys = jax.random.split(key, 2 * len(dims) + 3)
    ki = 0
    growth = []
    for din, dout in dims:
        bound = din ** -0.5
        W = jax.random.uniform(keys[ki], (din, dout), jnp.float32, -bound, bound); ki += 1
        b = jax.random.uniform(keys[ki], (1, dout), jnp.float32, -bound, bound); ki += 1
        growth.append((W, b))
    bound = in_layer ** -0.5
    Ws = jax.random.uniform(keys[ki], (in_layer, in_layer), jnp.float32, -bound, bound); ki += 1
    Wl = jax.random.uniform(keys[ki], (in_layer, nf * mf), jnp.float32, -bound, bound); ki += 1
    bl = jax.random.uniform(keys[ki], (1, nf * mf), jnp.float32, -bound, bound)
    mbias = jnp.zeros((1, mf), jnp.float32)  # nn.Parameter(torch.zeros(mf))
    return {"mf": mf, "growth": growth, "Ws": Ws, "Wl": Wl, "bl": bl, "mbias": mbias}


def edge_network_ref(afm, bfm, params):
    """Pure-JAX reference mirroring the PyTorch forward exactly."""
    B, N, nf = afm.shape
    ef = bfm.shape[-1]
    mf = params["mf"]
    x = bfm.reshape(-1, ef)
    for W, b in params["growth"]:
        x = jnp.maximum(x @ W + b, 0.0)
    for _ in range(N_SHARED_ITERS):
        x = jnp.maximum(x @ params["Ws"], 0.0)
    x = x @ params["Wl"] + params["bl"]
    e = x.reshape(B, N, N, mf, nf)
    e = jnp.transpose(e, (0, 1, 3, 2, 4)).reshape(B, N * mf, N * nf)
    msgs = jnp.einsum("bij,bj->bi", e, afm.reshape(B, N * nf))
    return msgs.reshape(B, N, mf) + params["mbias"].reshape(mf)


if __name__ == "__main__":
    key = jax.random.PRNGKey(0)
    B, N, nf, ef, mf = 2, 8, 4, 4, 8   # node_features=4, edge_features=4, message_features=8
    k_afm, k_bfm, k_par = jax.random.split(key, 3)
    afm = jax.random.normal(k_afm, (B, N, nf), jnp.float32)
    bfm = jax.random.normal(k_bfm, (B, N, N, ef), jnp.float32)
    params = init_params(k_par, nf, ef, mf)

    # num_chunks passed explicitly so the compiled kernel does not depend on
    # device sniffing (review correctness note).
    out = edge_network_pallas(afm, bfm, params, num_chunks=1)
    out = jax.block_until_ready(out)

    ref = edge_network_ref(afm, bfm, params)
    assert out.shape == (B, N, mf)
    err = float(jnp.max(jnp.abs(out - ref)))
    if err > 1e-3:
        raise AssertionError(f"kernel/reference mismatch, max abs err = {err}")
    print("KERNEL_OK")
</pallas_src>

<mosaic_0001>
module attributes {stable_mosaic.version = 11 : i64} {
  func.func @kernel(%arg0: i32, %arg1: memref<4x128xf32, #tpu.memory_space<vmem>>, %arg2: memref<4x16xf32, #tpu.memory_space<vmem>>, %arg3: memref<2x128xf32, #tpu.memory_space<vmem>>, %arg4: memref<160x128xf32, #tpu.memory_space<vmem>>, %arg5: memref<8x16xf32, #tpu.memory_space<vmem>>) attributes {dimension_semantics = [#tpu.dimension_semantics<parallel>], iteration_bounds = array<i64: 1>, scalar_prefetch = 0 : i64, scratch_operands = 0 : i64, tpu.core_type = #tpu.core_type<tc>, window_params = [{transform_indices = @transform_0, window_bounds = array<i64: 4, 128>}, {transform_indices = @transform_1, window_bounds = array<i64: 4, 16>}, {transform_indices = @transform_2, window_bounds = array<i64: 2, 128>}, {pipeline_mode = #tpu.pipeline_mode<synchronous>, transform_indices = @transform_3, window_bounds = array<i64: 160, 128>}, {transform_indices = @transform_4, window_bounds = array<i64: 8, 16>}]} {
    %c0 = arith.constant 0 : index
    %c0_0 = arith.constant 0 : index
    %0 = vector.load %arg1[%c0, %c0_0] : memref<4x128xf32, #tpu.memory_space<vmem>>, vector<4x128xf32>
    %c0_1 = arith.constant 0 : index
    %c0_2 = arith.constant 0 : index
    %1 = vector.load %arg4[%c0_1, %c0_2] : memref<160x128xf32, #tpu.memory_space<vmem>>, vector<16x128xf32>
    %2 = vector.extract_strided_slice %1 {offsets = [0, 0], sizes = [16, 4], strides = [1, 1]} : vector<16x128xf32> to vector<16x4xf32>
    %c16 = arith.constant 16 : index
    %c0_3 = arith.constant 0 : index
    %3 = vector.load %arg4[%c16, %c0_3] : memref<160x128xf32, #tpu.memory_space<vmem>>, vector<16x128xf32>
    %4 = vector.extract_strided_slice %3 {offsets = [0, 0], sizes = [16, 1], strides = [1, 1]} : vector<16x128xf32> to vector<16x1xf32>
    %cst = arith.constant dense<0.000000e+00> : vector<16x128xf32>
    %5 = tpu.matmul %2, %0, %cst {dimension_numbers = #tpu.dot_dimension_numbers<[1], [0], [0], [1], [0, 0, 1, 1], [], []>} : vector<16x4xf32>, vector<4x128xf32>, vector<16x128xf32> -> vector<16x128xf32>
    %6 = vector.broadcast %4 : vector<16x1xf32> to vector<16x128xf32>
    %7 = arith.addf %5, %6 : vector<16x128xf32>
    %cst_4 = arith.constant 0.000000e+00 : f32
    %8 = vector.broadcast %cst_4 : f32 to vector<16x128xf32>
    %9 = arith.maximumf %7, %8 : vector<16x128xf32>
    %c32 = arith.constant 32 : index
    %c0_5 = arith.constant 0 : index
    %10 = vector.load %arg4[%c32, %c0_5] : memref<160x128xf32, #tpu.memory_space<vmem>>, vector<16x128xf32>
    %11 = vector.extract_strided_slice %10 {offsets = [0, 0], sizes = [16, 16], strides = [1, 1]} : vector<16x128xf32> to vector<16x16xf32>
    %cst_6 = arith.constant dense<0.000000e+00> : vector<16x128xf32>
    %12 = tpu.matmul %11, %9, %cst_6 {dimension_numbers = #tpu.dot_dimension_numbers<[1], [0], [0], [1], [0, 0, 1, 1], [], []>} : vector<16x16xf32>, vector<16x128xf32>, vector<16x128xf32> -> vector<16x128xf32>
    %cst_7 = arith.constant 0.000000e+00 : f32
    %13 = vector.broadcast %cst_7 : f32 to vector<16x128xf32>
    %14 = arith.maximumf %12, %13 : vector<16x128xf32>
    %cst_8 = arith.constant dense<0.000000e+00> : vector<16x128xf32>
    %15 = tpu.matmul %11, %14, %cst_8 {dimension_numbers = #tpu.dot_dimension_numbers<[1], [0], [0], [1], [0, 0, 1, 1], [], []>} : vector<16x16xf32>, vector<16x128xf32>, vector<16x128xf32> -> vector<16x128xf32>
    %cst_9 = arith.constant 0.000000e+00 : f32
    %16 = vector.broadcast %cst_9 : f32 to vector<16x128xf32>
    %17 = arith.maximumf %15, %16 : vector<16x128xf32>
    %cst_10 = arith.constant dense<0.000000e+00> : vector<16x128xf32>
    %18 = tpu.matmul %11, %17, %cst_10 {dimension_numbers = #tpu.dot_dimension_numbers<[1], [0], [0], [1], [0, 0, 1, 1], [], []>} : vector<16x16xf32>, vector<16x128xf32>, vector<16x128xf32> -> vector<16x128xf32>
    %cst_11 = arith.constant 0.000000e+00 : f32
    %19 = vector.broadcast %cst_11 : f32 to vector<16x128xf32>
    %20 = arith.maximumf %18, %19 : vector<16x128xf32>
    %cst_12 = arith.constant dense<0.000000e+00> : vector<16x128xf32>
    %21 = tpu.matmul %11, %20, %cst_12 {dimension_numbers = #tpu.dot_dimension_numbers<[1], [0], [0], [1], [0, 0, 1, 1], [], []>} : vector<16x16xf32>, vector<16x128xf32>, vector<16x128xf32> -> vector<16x128xf32>
    %cst_13 = arith.constant 0.000000e+00 : f32
    %22 = vector.broadcast %cst_13 : f32 to vector<16x128xf32>
    %23 = arith.maximumf %21, %22 : vector<16x128xf32>
    %cst_14 = arith.constant dense<0.000000e+00> : vector<16x128xf32>
    %24 = tpu.matmul %11, %23, %cst_14 {dimension_numbers = #tpu.dot_dimension_numbers<[1], [0], [0], [1], [0, 0, 1, 1], [], []>} : vector<16x16xf32>, vector<16x128xf32>, vector<16x128xf32> -> vector<16x128xf32>
    %cst_15 = arith.constant 0.000000e+00 : f32
    %25 = vector.broadcast %cst_15 : f32 to vector<16x128xf32>
    %26 = arith.maximumf %24, %25 : vector<16x128xf32>
    %cst_16 = arith.constant dense<0.000000e+00> : vector<16x128xf32>
    %27 = tpu.matmul %11, %26, %cst_16 {dimension_numbers = #tpu.dot_dimension_numbers<[1], [0], [0], [1], [0, 0, 1, 1], [], []>} : vector<16x16xf32>, vector<16x128xf32>, vector<16x128xf32> -> vector<16x128xf32>
    %cst_17 = arith.constant 0.000000e+00 : f32
    %28 = vector.broadcast %cst_17 : f32 to vector<16x128xf32>
    %29 = arith.maximumf %27, %28 : vector<16x128xf32>
    %cst_18 = arith.constant dense<0.000000e+00> : vector<16x128xf32>
    %30 = tpu.matmul %11, %29, %cst_18 {dimension_numbers = #tpu.dot_dimension_numbers<[1], [0], [0], [1], [0, 0, 1, 1], [], []>} : vector<16x16xf32>, vector<16x128xf32>, vector<16x128xf32> -> vector<16x128xf32>
    %cst_19 = arith.constant 0.000000e+00 : f32
    %31 = vector.broadcast %cst_19 : f32 to vector<16x128xf32>
    %32 = arith.maximumf %30, %31 : vector<16x128xf32>
    %cst_20 = arith.constant dense<0.000000e+00> : vector<16x128xf32>
    %33 = tpu.matmul %11, %32, %cst_20 {dimension_numbers = #tpu.dot_dimension_numbers<[1], [0], [0], [1], [0, 0, 1, 1], [], []>} : vector<16x16xf32>, vector<16x128xf32>, vector<16x128xf32> -> vector<16x128xf32>
    %cst_21 = arith.constant 0.000000e+00 : f32
    %34 = vector.broadcast %cst_21 : f32 to vector<16x128xf32>
    %35 = arith.maximumf %33, %34 : vector<16x128xf32>
    %cst_22 = arith.constant dense<0.000000e+00> : vector<16x128xf32>
    %36 = tpu.matmul %11, %35, %cst_22 {dimension_numbers = #tpu.dot_dimension_numbers<[1], [0], [0], [1], [0, 0, 1, 1], [], []>} : vector<16x16xf32>, vector<16x128xf32>, vector<16x128xf32> -> vector<16x128xf32>
    %cst_23 = arith.constant 0.000000e+00 : f32
    %37 = vector.broadcast %cst_23 : f32 to vector<16x128xf32>
    %38 = arith.maximumf %36, %37 : vector<16x128xf32>
    %cst_24 = arith.constant dense<0.000000e+00> : vector<16x128xf32>
    %39 = tpu.matmul %11, %38, %cst_24 {dimension_numbers = #tpu.dot_dimension_numbers<[1], [0], [0], [1], [0, 0, 1, 1], [], []>} : vector<16x16xf32>, vector<16x128xf32>, vector<16x128xf32> -> vector<16x128xf32>
    %cst_25 = arith.constant 0.000000e+00 : f32
    %40 = vector.broadcast %cst_25 : f32 to vector<16x128xf32>
    %41 = arith.maximumf %39, %40 : vector<16x128xf32>
    %cst_26 = arith.constant dense<0.000000e+00> : vector<16x128xf32>
    %42 = tpu.matmul %11, %41, %cst_26 {dimension_numbers = #tpu.dot_dimension_numbers<[1], [0], [0], [1], [0, 0, 1, 1], [], []>} : vector<16x16xf32>, vector<16x128xf32>, vector<16x128xf32> -> vector<16x128xf32>
    %cst_27 = arith.constant 0.000000e+00 : f32
    %43 = vector.broadcast %cst_27 : f32 to vector<16x128xf32>
    %44 = arith.maximumf %42, %43 : vector<16x128xf32>
    %cst_28 = arith.constant dense<0.000000e+00> : vector<16x128xf32>
    %45 = tpu.matmul %11, %44, %cst_28 {dimension_numbers = #tpu.dot_dimension_numbers<[1], [0], [0], [1], [0, 0, 1, 1], [], []>} : vector<16x16xf32>, vector<16x128xf32>, vector<16x128xf32> -> vector<16x128xf32>
    %cst_29 = arith.constant 0.000000e+00 : f32
    %46 = vector.broadcast %cst_29 : f32 to vector<16x128xf32>
    %47 = arith.maximumf %45, %46 : vector<16x128xf32>
    %cst_30 = arith.constant dense<0.000000e+00> : vector<16x128xf32>
    %48 = tpu.matmul %11, %47, %cst_30 {dimension_numbers = #tpu.dot_dimension_numbers<[1], [0], [0], [1], [0, 0, 1, 1], [], []>} : vector<16x16xf32>, vector<16x128xf32>, vector<16x128xf32> -> vector<16x128xf32>
    %cst_31 = arith.constant 0.000000e+00 : f32
    %49 = vector.broadcast %cst_31 : f32 to vector<16x128xf32>
    %50 = arith.maximumf %48, %49 : vector<16x128xf32>
    %cst_32 = arith.constant dense<0.000000e+00> : vector<16x128xf32>
    %51 = tpu.matmul %11, %50, %cst_32 {dimension_numbers = #tpu.dot_dimension_numbers<[1], [0], [0], [1], [0, 0, 1, 1], [], []>} : vector<16x16xf32>, vector<16x128xf32>, vector<16x128xf32> -> vector<16x128xf32>
    %cst_33 = arith.constant 0.000000e+00 : f32
    %52 = vector.broadcast %cst_33 : f32 to vector<16x128xf32>
    %53 = arith.maximumf %51, %52 : vector<16x128xf32>
    %cst_34 = arith.constant dense<0.000000e+00> : vector<16x128xf32>
    %54 = tpu.matmul %11, %53, %cst_34 {dimension_numbers = #tpu.dot_dimension_numbers<[1], [0], [0], [1], [0, 0, 1, 1], [], []>} : vector<16x16xf32>, vector<16x128xf32>, vector<16x128xf32> -> vector<16x128xf32>
    %cst_35 = arith.constant 0.000000e+00 : f32
    %55 = vector.broadcast %cst_35 : f32 to vector<16x128xf32>
    %56 = arith.maximumf %54, %55 : vector<16x128xf32>
    %cst_36 = arith.constant dense<0.000000e+00> : vector<16x128xf32>
    %57 = tpu.matmul %11, %56, %cst_36 {dimension_numbers = #tpu.dot_dimension_numbers<[1], [0], [0], [1], [0, 0, 1, 1], [], []>} : vector<16x16xf32>, vector<16x128xf32>, vector<16x128xf32> -> vector<16x128xf32>
    %cst_37 = arith.constant 0.000000e+00 : f32
    %58 = vector.broadcast %cst_37 : f32 to vector<16x128xf32>
    %59 = arith.maximumf %57, %58 : vector<16x128xf32>
    %cst_38 = arith.constant dense<0.000000e+00> : vector<16x128xf32>
    %60 = tpu.matmul %11, %59, %cst_38 {dimension_numbers = #tpu.dot_dimension_numbers<[1], [0], [0], [1], [0, 0, 1, 1], [], []>} : vector<16x16xf32>, vector<16x128xf32>, vector<16x128xf32> -> vector<16x128xf32>
    %cst_39 = arith.constant 0.000000e+00 : f32
    %61 = vector.broadcast %cst_39 : f32 to vector<16x128xf32>
    %62 = arith.maximumf %60, %61 : vector<16x128xf32>
    %cst_40 = arith.constant dense<0.000000e+00> : vector<16x128xf32>
    %63 = tpu.matmul %11, %62, %cst_40 {dimension_numbers = #tpu.dot_dimension_numbers<[1], [0], [0], [1], [0, 0, 1, 1], [], []>} : vector<16x16xf32>, vector<16x128xf32>, vector<16x128xf32> -> vector<16x128xf32>
    %cst_41 = arith.constant 0.000000e+00 : f32
    %64 = vector.broadcast %cst_41 : f32 to vector<16x128xf32>
    %65 = arith.maximumf %63, %64 : vector<16x128xf32>
    %cst_42 = arith.constant dense<0.000000e+00> : vector<16x128xf32>
    %66 = tpu.matmul %11, %65, %cst_42 {dimension_numbers = #tpu.dot_dimension_numbers<[1], [0], [0], [1], [0, 0, 1, 1], [], []>} : vector<16x16xf32>, vector<16x128xf32>, vector<16x128xf32> -> vector<16x128xf32>
    %cst_43 = arith.constant 0.000000e+00 : f32
    %67 = vector.broadcast %cst_43 : f32 to vector<16x128xf32>
    %68 = arith.maximumf %66, %67 : vector<16x128xf32>
    %cst_44 = arith.constant dense<0.000000e+00> : vector<16x128xf32>
    %69 = tpu.matmul %11, %68, %cst_44 {dimension_numbers = #tpu.dot_dimension_numbers<[1], [0], [0], [1], [0, 0, 1, 1], [], []>} : vector<16x16xf32>, vector<16x128xf32>, vector<16x128xf32> -> vector<16x128xf32>
    %cst_45 = arith.constant 0.000000e+00 : f32
    %70 = vector.broadcast %cst_45 : f32 to vector<16x128xf32>
    %71 = arith.maximumf %69, %70 : vector<16x128xf32>
    %cst_46 = arith.constant dense<0.000000e+00> : vector<16x128xf32>
    %72 = tpu.matmul %11, %71, %cst_46 {dimension_numbers = #tpu.dot_dimension_numbers<[1], [0], [0], [1], [0, 0, 1, 1], [], []>} : vector<16x16xf32>, vector<16x128xf32>, vector<16x128xf32> -> vector<16x128xf32>
    %cst_47 = arith.constant 0.000000e+00 : f32
    %73 = vector.broadcast %cst_47 : f32 to vector<16x128xf32>
    %74 = arith.maximumf %72, %73 : vector<16x128xf32>
    %cst_48 = arith.constant dense<0.000000e+00> : vector<16x128xf32>
    %75 = tpu.matmul %11, %74, %cst_48 {dimension_numbers = #tpu.dot_dimension_numbers<[1], [0], [0], [1], [0, 0, 1, 1], [], []>} : vector<16x16xf32>, vector<16x128xf32>, vector<16x128xf32> -> vector<16x128xf32>
    %cst_49 = arith.constant 0.000000e+00 : f32
    %76 = vector.broadcast %cst_49 : f32 to vector<16x128xf32>
    %77 = arith.maximumf %75, %76 : vector<16x128xf32>
    %cst_50 = arith.constant dense<0.000000e+00> : vector<16x128xf32>
    %78 = tpu.matmul %11, %77, %cst_50 {dimension_numbers = #tpu.dot_dimension_numbers<[1], [0], [0], [1], [0, 0, 1, 1], [], []>} : vector<16x16xf32>, vector<16x128xf32>, vector<16x128xf32> -> vector<16x128xf32>
    %cst_51 = arith.constant 0.000000e+00 : f32
    %79 = vector.broadcast %cst_51 : f32 to vector<16x128xf32>
    %80 = arith.maximumf %78, %79 : vector<16x128xf32>
    %cst_52 = arith.constant dense<0.000000e+00> : vector<16x128xf32>
    %81 = tpu.matmul %11, %80, %cst_52 {dimension_numbers = #tpu.dot_dimension_numbers<[1], [0], [0], [1], [0, 0, 1, 1], [], []>} : vector<16x16xf32>, vector<16x128xf32>, vector<16x128xf32> -> vector<16x128xf32>
    %cst_53 = arith.constant 0.000000e+00 : f32
    %82 = vector.broadcast %cst_53 : f32 to vector<16x128xf32>
    %83 = arith.maximumf %81, %82 : vector<16x128xf32>
    %cst_54 = arith.constant dense<0.000000e+00> : vector<16x128xf32>
    %84 = tpu.matmul %11, %83, %cst_54 {dimension_numbers = #tpu.dot_dimension_numbers<[1], [0], [0], [1], [0, 0, 1, 1], [], []>} : vector<16x16xf32>, vector<16x128xf32>, vector<16x128xf32> -> vector<16x128xf32>
    %cst_55 = arith.constant 0.000000e+00 : f32
    %85 = vector.broadcast %cst_55 : f32 to vector<16x128xf32>
    %86 = arith.maximumf %84, %85 : vector<16x128xf32>
    %cst_56 = arith.constant dense<0.000000e+00> : vector<16x128xf32>
    %87 = tpu.matmul %11, %86, %cst_56 {dimension_numbers = #tpu.dot_dimension_numbers<[1], [0], [0], [1], [0, 0, 1, 1], [], []>} : vector<16x16xf32>, vector<16x128xf32>, vector<16x128xf32> -> vector<16x128xf32>
    %cst_57 = arith.constant 0.000000e+00 : f32
    %88 = vector.broadcast %cst_57 : f32 to vector<16x128xf32>
    %89 = arith.maximumf %87, %88 : vector<16x128xf32>
    %cst_58 = arith.constant dense<0.000000e+00> : vector<16x128xf32>
    %90 = tpu.matmul %11, %89, %cst_58 {dimension_numbers = #tpu.dot_dimension_numbers<[1], [0], [0], [1], [0, 0, 1, 1], [], []>} : vector<16x16xf32>, vector<16x128xf32>, vector<16x128xf32> -> vector<16x128xf32>
    %cst_59 = arith.constant 0.000000e+00 : f32
    %91 = vector.broadcast %cst_59 : f32 to vector<16x128xf32>
    %92 = arith.maximumf %90, %91 : vector<16x128xf32>
    %cst_60 = arith.constant dense<0.000000e+00> : vector<16x128xf32>
    %93 = tpu.matmul %11, %92, %cst_60 {dimension_numbers = #tpu.dot_dimension_numbers<[1], [0], [0], [1], [0, 0, 1, 1], [], []>} : vector<16x16xf32>, vector<16x128xf32>, vector<16x128xf32> -> vector<16x128xf32>
    %cst_61 = arith.constant 0.000000e+00 : f32
    %94 = vector.broadcast %cst_61 : f32 to vector<16x128xf32>
    %95 = arith.maximumf %93, %94 : vector<16x128xf32>
    %cst_62 = arith.constant dense<0.000000e+00> : vector<16x128xf32>
    %96 = tpu.matmul %11, %95, %cst_62 {dimension_numbers = #tpu.dot_dimension_numbers<[1], [0], [0], [1], [0, 0, 1, 1], [], []>} : vector<16x16xf32>, vector<16x128xf32>, vector<16x128xf32> -> vector<16x128xf32>
    %cst_63 = arith.constant 0.000000e+00 : f32
    %97 = vector.broadcast %cst_63 : f32 to vector<16x128xf32>
    %98 = arith.maximumf %96, %97 : vector<16x128xf32>
    %cst_64 = arith.constant dense<0.000000e+00> : vector<16x128xf32>
    %99 = tpu.matmul %11, %98, %cst_64 {dimension_numbers = #tpu.dot_dimension_numbers<[1], [0], [0], [1], [0, 0, 1, 1], [], []>} : vector<16x16xf32>, vector<16x128xf32>, vector<16x128xf32> -> vector<16x128xf32>
    %cst_65 = arith.constant 0.000000e+00 : f32
    %100 = vector.broadcast %cst_65 : f32 to vector<16x128xf32>
    %101 = arith.maximumf %99, %100 : vector<16x128xf32>
    %cst_66 = arith.constant dense<0.000000e+00> : vector<16x128xf32>
    %102 = tpu.matmul %11, %101, %cst_66 {dimension_numbers = #tpu.dot_dimension_numbers<[1], [0], [0], [1], [0, 0, 1, 1], [], []>} : vector<16x16xf32>, vector<16x128xf32>, vector<16x128xf32> -> vector<16x128xf32>
    %cst_67 = arith.constant 0.000000e+00 : f32
    %103 = vector.broadcast %cst_67 : f32 to vector<16x128xf32>
    %104 = arith.maximumf %102, %103 : vector<16x128xf32>
    %cst_68 = arith.constant dense<0.000000e+00> : vector<16x128xf32>
    %105 = tpu.matmul %11, %104, %cst_68 {dimension_numbers = #tpu.dot_dimension_numbers<[1], [0], [0], [1], [0, 0, 1, 1], [], []>} : vector<16x16xf32>, vector<16x128xf32>, vector<16x128xf32> -> vector<16x128xf32>
    %cst_69 = arith.constant 0.000000e+00 : f32
    %106 = vector.broadcast %cst_69 : f32 to vector<16x128xf32>
    %107 = arith.maximumf %105, %106 : vector<16x128xf32>
    %cst_70 = arith.constant dense<0.000000e+00> : vector<16x128xf32>
    %108 = tpu.matmul %11, %107, %cst_70 {dimension_numbers = #tpu.dot_dimension_numbers<[1], [0], [0], [1], [0, 0, 1, 1], [], []>} : vector<16x16xf32>, vector<16x128xf32>, vector<16x128xf32> -> vector<16x128xf32>
    %cst_71 = arith.constant 0.000000e+00 : f32
    %109 = vector.broadcast %cst_71 : f32 to vector<16x128xf32>
    %110 = arith.maximumf %108, %109 : vector<16x128xf32>
    %cst_72 = arith.constant dense<0.000000e+00> : vector<16x128xf32>
    %111 = tpu.matmul %11, %110, %cst_72 {dimension_numbers = #tpu.dot_dimension_numbers<[1], [0], [0], [1], [0, 0, 1, 1], [], []>} : vector<16x16xf32>, vector<16x128xf32>, vector<16x128xf32> -> vector<16x128xf32>
    %cst_73 = arith.constant 0.000000e+00 : f32
    %112 = vector.broadcast %cst_73 : f32 to vector<16x128xf32>
    %113 = arith.maximumf %111, %112 : vector<16x128xf32>
    %cst_74 = arith.constant dense<0.000000e+00> : vector<16x128xf32>
    %114 = tpu.matmul %11, %113, %cst_74 {dimension_numbers = #tpu.dot_dimension_numbers<[1], [0], [0], [1], [0, 0, 1, 1], [], []>} : vector<16x16xf32>, vector<16x128xf32>, vector<16x128xf32> -> vector<16x128xf32>
    %cst_75 = arith.constant 0.000000e+00 : f32
    %115 = vector.broadcast %cst_75 : f32 to vector<16x128xf32>
    %116 = arith.maximumf %114, %115 : vector<16x128xf32>
    %cst_76 = arith.constant dense<0.000000e+00> : vector<16x128xf32>
    %117 = tpu.matmul %11, %116, %cst_76 {dimension_numbers = #tpu.dot_dimension_numbers<[1], [0], [0], [1], [0, 0, 1, 1], [], []>} : vector<16x16xf32>, vector<16x128xf32>, vector<16x128xf32> -> vector<16x128xf32>
    %cst_77 = arith.constant 0.000000e+00 : f32
    %118 = vector.broadcast %cst_77 : f32 to vector<16x128xf32>
    %119 = arith.maximumf %117, %118 : vector<16x128xf32>
    %cst_78 = arith.constant dense<0.000000e+00> : vector<16x128xf32>
    %120 = tpu.matmul %11, %119, %cst_78 {dimension_numbers = #tpu.dot_dimension_numbers<[1], [0], [0], [1], [0, 0, 1, 1], [], []>} : vector<16x16xf32>, vector<16x128xf32>, vector<16x128xf32> -> vector<16x128xf32>
    %cst_79 = arith.constant 0.000000e+00 : f32
    %121 = vector.broadcast %cst_79 : f32 to vector<16x128xf32>
    %122 = arith.maximumf %120, %121 : vector<16x128xf32>
    %cst_80 = arith.constant dense<0.000000e+00> : vector<16x128xf32>
    %123 = tpu.matmul %11, %122, %cst_80 {dimension_numbers = #tpu.dot_dimension_numbers<[1], [0], [0], [1], [0, 0, 1, 1], [], []>} : vector<16x16xf32>, vector<16x128xf32>, vector<16x128xf32> -> vector<16x128xf32>
    %cst_81 = arith.constant 0.000000e+00 : f32
    %124 = vector.broadcast %cst_81 : f32 to vector<16x128xf32>
    %125 = arith.maximumf %123, %124 : vector<16x128xf32>
    %cst_82 = arith.constant dense<0.000000e+00> : vector<16x128xf32>
    %126 = tpu.matmul %11, %125, %cst_82 {dimension_numbers = #tpu.dot_dimension_numbers<[1], [0], [0], [1], [0, 0, 1, 1], [], []>} : vector<16x16xf32>, vector<16x128xf32>, vector<16x128xf32> -> vector<16x128xf32>
    %cst_83 = arith.constant 0.000000e+00 : f32
    %127 = vector.broadcast %cst_83 : f32 to vector<16x128xf32>
    %128 = arith.maximumf %126, %127 : vector<16x128xf32>
    %cst_84 = arith.constant dense<0.000000e+00> : vector<16x128xf32>
    %129 = tpu.matmul %11, %128, %cst_84 {dimension_numbers = #tpu.dot_dimension_numbers<[1], [0], [0], [1], [0, 0, 1, 1], [], []>} : vector<16x16xf32>, vector<16x128xf32>, vector<16x128xf32> -> vector<16x128xf32>
    %cst_85 = arith.constant 0.000000e+00 : f32
    %130 = vector.broadcast %cst_85 : f32 to vector<16x128xf32>
    %131 = arith.maximumf %129, %130 : vector<16x128xf32>
    %cst_86 = arith.constant dense<0.000000e+00> : vector<16x128xf32>
    %132 = tpu.matmul %11, %131, %cst_86 {dimension_numbers = #tpu.dot_dimension_numbers<[1], [0], [0], [1], [0, 0, 1, 1], [], []>} : vector<16x16xf32>, vector<16x128xf32>, vector<16x128xf32> -> vector<16x128xf32>
    %cst_87 = arith.constant 0.000000e+00 : f32
    %133 = vector.broadcast %cst_87 : f32 to vector<16x128xf32>
    %134 = arith.maximumf %132, %133 : vector<16x128xf32>
    %cst_88 = arith.constant dense<0.000000e+00> : vector<16x128xf32>
    %135 = tpu.matmul %11, %134, %cst_88 {dimension_numbers = #tpu.dot_dimension_numbers<[1], [0], [0], [1], [0, 0, 1, 1], [], []>} : vector<16x16xf32>, vector<16x128xf32>, vector<16x128xf32> -> vector<16x128xf32>
    %cst_89 = arith.constant 0.000000e+00 : f32
    %136 = vector.broadcast %cst_89 : f32 to vector<16x128xf32>
    %137 = arith.maximumf %135, %136 : vector<16x128xf32>
    %cst_90 = arith.constant dense<0.000000e+00> : vector<16x128xf32>
    %138 = tpu.matmul %11, %137, %cst_90 {dimension_numbers = #tpu.dot_dimension_numbers<[1], [0], [0], [1], [0, 0, 1, 1], [], []>} : vector<16x16xf32>, vector<16x128xf32>, vector<16x128xf32> -> vector<16x128xf32>
    %cst_91 = arith.constant 0.000000e+00 : f32
    %139 = vector.broadcast %cst_91 : f32 to vector<16x128xf32>
    %140 = arith.maximumf %138, %139 : vector<16x128xf32>
    %cst_92 = arith.constant dense<0.000000e+00> : vector<16x128xf32>
    %141 = tpu.matmul %11, %140, %cst_92 {dimension_numbers = #tpu.dot_dimension_numbers<[1], [0], [0], [1], [0, 0, 1, 1], [], []>} : vector<16x16xf32>, vector<16x128xf32>, vector<16x128xf32> -> vector<16x128xf32>
    %cst_93 = arith.constant 0.000000e+00 : f32
    %142 = vector.broadcast %cst_93 : f32 to vector<16x128xf32>
    %143 = arith.maximumf %141, %142 : vector<16x128xf32>
    %cst_94 = arith.constant dense<0.000000e+00> : vector<16x128xf32>
    %144 = tpu.matmul %11, %143, %cst_94 {dimension_numbers = #tpu.dot_dimension_numbers<[1], [0], [0], [1], [0, 0, 1, 1], [], []>} : vector<16x16xf32>, vector<16x128xf32>, vector<16x128xf32> -> vector<16x128xf32>
    %cst_95 = arith.constant 0.000000e+00 : f32
    %145 = vector.broadcast %cst_95 : f32 to vector<16x128xf32>
    %146 = arith.maximumf %144, %145 : vector<16x128xf32>
    %cst_96 = arith.constant dense<0.000000e+00> : vector<16x128xf32>
    %147 = tpu.matmul %11, %146, %cst_96 {dimension_numbers = #tpu.dot_dimension_numbers<[1], [0], [0], [1], [0, 0, 1, 1], [], []>} : vector<16x16xf32>, vector<16x128xf32>, vector<16x128xf32> -> vector<16x128xf32>
    %cst_97 = arith.constant 0.000000e+00 : f32
    %148 = vector.broadcast %cst_97 : f32 to vector<16x128xf32>
    %149 = arith.maximumf %147, %148 : vector<16x128xf32>
    %cst_98 = arith.constant dense<0.000000e+00> : vector<16x128xf32>
    %150 = tpu.matmul %11, %149, %cst_98 {dimension_numbers = #tpu.dot_dimension_numbers<[1], [0], [0], [1], [0, 0, 1, 1], [], []>} : vector<16x16xf32>, vector<16x128xf32>, vector<16x128xf32> -> vector<16x128xf32>
    %cst_99 = arith.constant 0.000000e+00 : f32
    %151 = vector.broadcast %cst_99 : f32 to vector<16x128xf32>
    %152 = arith.maximumf %150, %151 : vector<16x128xf32>
    %cst_100 = arith.constant dense<0.000000e+00> : vector<16x128xf32>
    %153 = tpu.matmul %11, %152, %cst_100 {dimension_numbers = #tpu.dot_dimension_numbers<[1], [0], [0], [1], [0, 0, 1, 1], [], []>} : vector<16x16xf32>, vector<16x128xf32>, vector<16x128xf32> -> vector<16x128xf32>
    %cst_101 = arith.constant 0.000000e+00 : f32
    %154 = vector.broadcast %cst_101 : f32 to vector<16x128xf32>
    %155 = arith.maximumf %153, %154 : vector<16x128xf32>
    %cst_102 = arith.constant dense<0.000000e+00> : vector<16x128xf32>
    %156 = tpu.matmul %11, %155, %cst_102 {dimension_numbers = #tpu.dot_dimension_numbers<[1], [0], [0], [1], [0, 0, 1, 1], [], []>} : vector<16x16xf32>, vector<16x128xf32>, vector<16x128xf32> -> vector<16x128xf32>
    %cst_103 = arith.constant 0.000000e+00 : f32
    %157 = vector.broadcast %cst_103 : f32 to vector<16x128xf32>
    %158 = arith.maximumf %156, %157 : vector<16x128xf32>
    %cst_104 = arith.constant dense<0.000000e+00> : vector<16x128xf32>
    %159 = tpu.matmul %11, %158, %cst_104 {dimension_numbers = #tpu.dot_dimension_numbers<[1], [0], [0], [1], [0, 0, 1, 1], [], []>} : vector<16x16xf32>, vector<16x128xf32>, vector<16x128xf32> -> vector<16x128xf32>
    %cst_105 = arith.constant 0.000000e+00 : f32
    %160 = vector.broadcast %cst_105 : f32 to vector<16x128xf32>
    %161 = arith.maximumf %159, %160 : vector<16x128xf32>
    %c48 = arith.constant 48 : index
    %c0_106 = arith.constant 0 : index
    %162 = vector.load %arg4[%c48, %c0_106] : memref<160x128xf32, #tpu.memory_space<vmem>>, vector<32x128xf32>
    %163 = vector.extract_strided_slice %162 {offsets = [0, 0], sizes = [32, 16], strides = [1, 1]} : vector<32x128xf32> to vector<32x16xf32>
    %c80 = arith.constant 80 : index
    %c0_107 = arith.constant 0 : index
    %164 = vector.load %arg4[%c80, %c0_107] : memref<160x128xf32, #tpu.memory_space<vmem>>, vector<32x128xf32>
    %165 = vector.extract_strided_slice %164 {offsets = [0, 0], sizes = [32, 1], strides = [1, 1]} : vector<32x128xf32> to vector<32x1xf32>
    %cst_108 = arith.constant dense<0.000000e+00> : vector<32x128xf32>
    %166 = tpu.matmul %163, %161, %cst_108 {dimension_numbers = #tpu.dot_dimension_numbers<[1], [0], [0], [1], [0, 0, 1, 1], [], []>} : vector<32x16xf32>, vector<16x128xf32>, vector<32x128xf32> -> vector<32x128xf32>
    %167 = vector.broadcast %165 : vector<32x1xf32> to vector<32x128xf32>
    %168 = arith.addf %166, %167 : vector<32x128xf32>
    %c0_109 = arith.constant 0 : index
    %c0_110 = arith.constant 0 : index
    %169 = vector.load %arg3[%c0_109, %c0_110] : memref<2x128xf32, #tpu.memory_space<vmem>>, vector<1x128xf32>
    %c1 = arith.constant 1 : index
    %c0_111 = arith.constant 0 : index
    %170 = vector.load %arg3[%c1, %c0_111] : memref<2x128xf32, #tpu.memory_space<vmem>>, vector<1x128xf32>
    %171 = tpu.iota {dimensions = array<i32: 0>} : vector<16x128xi32>
    %172 = arith.sitofp %171 : vector<16x128xi32> to vector<16x128xf32>
    %173 = vector.broadcast %169 : vector<1x128xf32> to vector<16x128xf32>
    %174 = arith.cmpf oeq, %172, %173 : vector<16x128xf32>
    %cst_112 = arith.constant 1.000000e+00 : f32
    %cst_113 = arith.constant 0.000000e+00 : f32
    %175 = vector.broadcast %cst_112 : f32 to vector<16x128xf32>
    %176 = vector.broadcast %cst_113 : f32 to vector<16x128xf32>
    %177 = arith.select %174, %175, %176 : vector<16x128xi1>, vector<16x128xf32>
    %c0_114 = arith.constant 0 : index
    %c0_115 = arith.constant 0 : index
    %178 = vector.load %arg2[%c0_114, %c0_115] : memref<4x16xf32, #tpu.memory_space<vmem>>, vector<4x16xf32>
    %cst_116 = arith.constant dense<0.000000e+00> : vector<4x128xf32>
    %179 = tpu.matmul %178, %177, %cst_116 {dimension_numbers = #tpu.dot_dimension_numbers<[1], [0], [0], [1], [0, 0, 1, 1], [], []>} : vector<4x16xf32>, vector<16x128xf32>, vector<4x128xf32> -> vector<4x128xf32>
    %c112 = arith.constant 112 : index
    %c0_117 = arith.constant 0 : index
    %180 = vector.load %arg4[%c112, %c0_117] : memref<160x128xf32, #tpu.memory_space<vmem>>, vector<32x128xf32>
    %181 = vector.extract_strided_slice %180 {offsets = [0, 0], sizes = [32, 4], strides = [1, 1]} : vector<32x128xf32> to vector<32x4xf32>
    %cst_118 = arith.constant dense<0.000000e+00> : vector<32x128xf32>
    %182 = tpu.matmul %181, %179, %cst_118 {dimension_numbers = #tpu.dot_dimension_numbers<[1], [0], [0], [1], [0, 0, 1, 1], [], []>} : vector<32x4xf32>, vector<4x128xf32>, vector<32x128xf32> -> vector<32x128xf32>
    %c144 = arith.constant 144 : index
    %c0_119 = arith.constant 0 : index
    %183 = vector.load %arg4[%c144, %c0_119] : memref<160x128xf32, #tpu.memory_space<vmem>>, vector<8x128xf32>
    %184 = vector.extract_strided_slice %183 {offsets = [0, 0], sizes = [8, 32], strides = [1, 1]} : vector<8x128xf32> to vector<8x32xf32>
    %185 = arith.mulf %168, %182 : vector<32x128xf32>
    %cst_120 = arith.constant dense<0.000000e+00> : vector<8x128xf32>
    %186 = tpu.matmul %184, %185, %cst_120 {dimension_numbers = #tpu.dot_dimension_numbers<[1], [0], [0], [1], [0, 0, 1, 1], [], []>} : vector<8x32xf32>, vector<32x128xf32>, vector<8x128xf32> -> vector<8x128xf32>
    %187 = tpu.iota {dimensions = array<i32: 0>} : vector<128x128xi32>
    %188 = arith.sitofp %187 : vector<128x128xi32> to vector<128x128xf32>
    %189 = vector.broadcast %170 : vector<1x128xf32> to vector<128x128xf32>
    %190 = arith.cmpf oeq, %188, %189 : vector<128x128xf32>
    %cst_121 = arith.constant 1.000000e+00 : f32
    %cst_122 = arith.constant 0.000000e+00 : f32
    %191 = vector.broadcast %cst_121 : f32 to vector<128x128xf32>
    %192 = vector.broadcast %cst_122 : f32 to vector<128x128xf32>
    %193 = arith.select %190, %191, %192 : vector<128x128xi1>, vector<128x128xf32>
    %cst_123 = arith.constant dense<0.000000e+00> : vector<8x128xf32>
    %194 = tpu.matmul %186, %193, %cst_123 {dimension_numbers = #tpu.dot_dimension_numbers<[1], [1], [0], [0], [0, 0, 1, 0], [], []>} : vector<8x128xf32>, vector<128x128xf32>, vector<8x128xf32> -> vector<8x128xf32>
    %c152 = arith.constant 152 : index
    %c0_124 = arith.constant 0 : index
    %195 = vector.load %arg4[%c152, %c0_124] : memref<160x128xf32, #tpu.memory_space<vmem>>, vector<8x128xf32>
    %196 = vector.extract_strided_slice %195 {offsets = [0, 0], sizes = [8, 1], strides = [1, 1]} : vector<8x128xf32> to vector<8x1xf32>
    %197 = vector.extract_strided_slice %194 {offsets = [0, 0], sizes = [8, 16], strides = [1, 1]} : vector<8x128xf32> to vector<8x16xf32>
    %198 = vector.broadcast %196 : vector<8x1xf32> to vector<8x16xf32>
    %199 = arith.addf %197, %198 : vector<8x16xf32>
    %c0_125 = arith.constant 0 : index
    %c0_126 = arith.constant 0 : index
    %200 = vector.load %arg5[%c0_125, %c0_126] : memref<8x16xf32, #tpu.memory_space<vmem>>, vector<8x16xf32>
    tpu.vector_store %arg5[%c0_125, %c0_126], %199 {strides = array<i32>} : memref<8x16xf32, #tpu.memory_space<vmem>>, vector<8x16xf32>,
    return
  }
  func.func @transform_0(%arg0: i32) -> (i32, i32) {
    %c0_i32 = arith.constant 0 : i32
    %c0_i32_0 = arith.constant 0 : i32
    return %c0_i32, %arg0 : i32, i32
  }
  func.func @transform_1(%arg0: i32) -> (i32, i32) {
    %c0_i32 = arith.constant 0 : i32
    %c0_i32_0 = arith.constant 0 : i32
    return %c0_i32, %arg0 : i32, i32
  }
  func.func @transform_2(%arg0: i32) -> (i32, i32) {
    %c0_i32 = arith.constant 0 : i32
    %c0_i32_0 = arith.constant 0 : i32
    return %c0_i32, %arg0 : i32, i32
  }
  func.func @transform_3(%arg0: i32) -> (i32, i32) {
    %c0_i32 = arith.constant 0 : i32
    %c0_i32_0 = arith.constant 0 : i32
    %c0_i32_1 = arith.constant 0 : i32
    return %c0_i32, %c0_i32_0 : i32, i32
  }
  func.func @transform_4(%arg0: i32) -> (i32, i32) {
    %c0_i32 = arith.constant 0 : i32
    %c0_i32_0 = arith.constant 0 : i32
    return %c0_i32, %arg0 : i32, i32
  }
}

</mosaic_0001>

<bundles_post_ra>
// kernel: tpu_custom_call.1
= control target key start
LH: loop header
LB: loop body
LE: loop exit
PB: predicated region body
PF: predicated region fallthrough
CT: control target
= control target key end

     0   :  { %9 = vsyncpa [#allocation3], 0  ;;  %s6087_s0 = inlined_call_operand.hbm [shape: f32[4,128], index: 0, kind: input, shape index: {}]   ;;  %s6088_s1 = inlined_call_operand.hbm [shape: f32[4,16], index: 1, kind: input, shape index: {}]   ;;  %s6089_s2 = inlined_call_operand.vmem [shape: f32[2,128], index: 2, kind: input, shape index: {}]   ;;  %s6090_s3 = inlined_call_operand.hbm [shape: f32[160,128], index: 3, kind: input, shape index: {}]   ;;  %s6091_s4 = inlined_call_operand.hbm [shape: f32[8,16], index: 4, kind: output, shape index: {}]  }
   0x1   :  { %10 = vsyncpa [#allocation6], 0 }
   0x2   :  { %11 = vsyncpa [#allocation4], 0  ;;  %s5715_s15 = smov [#allocation5]   ;;  %s5716_s17 = smov [#allocation2]  }
   0x3   :  { %s28_s16 = sshll.u32 %s5715_s15, 4  ;;  %s18_s18 = sshll.u32 %s5716_s17, 4  ;;  %s29_s16 = int_to_ptr.vmem [resolvable:$true] %s28_s16  ;;  %s19_s18 = int_to_ptr.vmem [resolvable:$true] %s18_s18 }
   0x4   :  { %s5621_s21 = scalar_lea.hbm %s6088_s1, 64 }
   0x5   :  { %p5622_p0 = scmp.ne.s32.totalorder %s6088_s1, %s5621_s21  ;;  %p5625_p1 = scmp.lt.u32.totalorder %s5621_s21, %s6088_s1 }
   0x7   :  { %p5627_p2 = pnand %p5625_p1, %p5622_p0 }
   0x9   :  { %5630 = shalt.err (!%p5627_p2)
}
   0xa   :  { %s5631_s26 = scalar_lea.vmem %s29_s16, 64  ;;  %p5636_p4 = scmp.lt.s32.totalorder %s29_s16, %s29_s16 }
   0xb   :  { %p5632_p3 = scmp.ne.s32.totalorder %s29_s16, %s5631_s26  ;;  %p5637_p5 = scmp.lt.s32.totalorder %s5631_s26, %s5631_s26 }
   0xd   :  { %p5638_p6 = por %p5637_p5, %p5636_p4 }
   0xf   :  { %p5639_p7 = pnand %p5638_p6, %p5632_p3 }
  0x11   :  { %5642 = shalt.err (!%p5639_p7)
}
  0x12   :  { %31 = dma.hbm_to_vmem [thread:$0]  %s6088_s1, 64, %s29_s16, [#allocation6]  }
  0x13   :  { %s5643_s5 = scalar_lea.hbm %s6087_s0, 64 }
  0x14   :  { %p5644_p8 = scmp.ne.s32.totalorder %s6087_s0, %s5643_s5  ;;  %p5647_p9 = scmp.lt.u32.totalorder %s5643_s5, %s6087_s0 }
  0x16   :  { %p5649_p10 = pnand %p5647_p9, %p5644_p8 }
  0x18   :  { %5652 = shalt.err (!%p5649_p10)
}
  0x19   :  { %s5653_s10 = scalar_lea.vmem %s19_s18, 64  ;;  %p5658_p12 = scmp.lt.s32.totalorder %s19_s18, %s19_s18 }
  0x1a   :  { %p5654_p11 = scmp.ne.s32.totalorder %s19_s18, %s5653_s10  ;;  %p5659_p13 = scmp.lt.s32.totalorder %s5653_s10, %s5653_s10 }
  0x1c   :  { %p5660_p0 = por %p5659_p13, %p5658_p12 }
  0x1e   :  { %p5661_p1 = pnand %p5660_p0, %p5654_p11 }
  0x20   :  { %5664 = shalt.err (!%p5661_p1)
}
  0x21   :  { %21 = dma.hbm_to_vmem [thread:$0]  %s6087_s0, 64, %s19_s18, [#allocation3]  }
  0x22   :  { %s5717_s12 = smov [#allocation7]   ;;  %s5665_s16 = scalar_lea.hbm %s6090_s3, 2560 }
  0x23   :  { %s39_s13 = sshll.u32 %s5717_s12, 4  ;;  %p5666_p2 = scmp.ne.s32.totalorder %s6090_s3, %s5665_s16  ;;  %s40_s13 = int_to_ptr.vmem [resolvable:$true] %s39_s13 }
  0x24   :  { %p5669_p3 = scmp.lt.u32.totalorder %s5665_s16, %s6090_s3 }
  0x26   :  { %p5671_p4 = pnand %p5669_p3, %p5666_p2 }
  0x28   :  { %5674 = shalt.err (!%p5671_p4)
}
  0x29   :  { %s5675_s22 = scalar_lea.vmem %s40_s13, 2560  ;;  %p5680_p6 = scmp.lt.s32.totalorder %s40_s13, %s40_s13 }
  0x2a   :  { %p5676_p5 = scmp.ne.s32.totalorder %s40_s13, %s5675_s22  ;;  %p5681_p7 = scmp.lt.s32.totalorder %s5675_s22, %s5675_s22 }
  0x2c   :  { %p5682_p8 = por %p5681_p7, %p5680_p6 }
  0x2e   :  { %p5683_p9 = pnand %p5682_p8, %p5676_p5 }
  0x30   :  { %5686 = shalt.err (!%p5683_p9)
}
  0x31   :  { %s5718_s0 = smov 128   ;;  %s5719_s18 = smov 8  }
  0x32   :  { %45 = dma.hbm_to_vmem [thread:$0]  %s6090_s3, 2560, %s40_s13, [#allocation6], %s5718_s0, %s5718_s0, %s5719_s18  }
  0x33   :  { %5709 = dma.done.wait [#allocation3], 64  }
  0x34   :  { %5710 = vsyncadd [#allocation3], 4294967232 }
  0x35   :  { %5711 = dma.done.wait [#allocation6], 2624  }
  0x36   :  { %5712 = vsyncadd [#allocation6], 4294964672  ;;  %v5720_v0 = vmov 0   ;;  %vm77_vm0 = vcmask 1043456   ;;  %vm70_vm1 = vcmask 31744   ;;  %v56_v2 = vld [vmem:[#allocation7] sm:$0xff] }
  0x37   :  { %5619 = vset.pattern.permute.xlu0 %v5720_v0  ;;  %5620 = vset.pattern.permute.xlu1 %v5720_v0  ;;  %v55_v1 = vld [vmem:[#allocation2] sm:$0xf]  ;;  %v57_v3 = vld [vmem:[#allocation7 + $0x8] sm:$0xff]  ;;  %v58_v4 = vld [vmem:[#allocation7 + $0x10] sm:$0xff]  ;;  %vm160_vm2 = vcmask 130048   ;;  %vm5723_vm6 = vmmov 0  }
  0x38   :  { %4945 = vmatprep.subr.msk.mxu1 %vm77_vm0, %v55_v1  ;;  %4947 = vmatprep.mubr.msk.f32.mxu1 %vm70_vm1, %v56_v2  ;;  %v59_v5 = vld [vmem:[#allocation7 + $0x18] sm:$0xff]  ;;  %v4023_v6 = vld [vmem:[#allocation7 + $0x60] sm:$0xff]  ;;  %v5797_v18 = vld [vmem:[#allocation7 + $0x28] sm:$0xff] }
  0x39   :  { %4946 = vmatpush3.msk.msra.mxu1 %vm77_vm0, %v55_v1  ;;  %62 = vperm.xlu0 %5619, %v58_v4   ;;  %v4548_v7 = vld [vmem:[#allocation7 + $0x98] sm:$0xff]  ;;  %v5791_v8 = vld [vmem:[#allocation7 + $0x20] sm:$0xff] }
  0x3a   :  { %4948 = vmatmul.mubr.msk.f32.vlgmr.msra.gmra.mrb[0].mxu1 %vm70_vm1, %v57_v3  ;;  %5059 = vmatprep.mubr.msk.f32.mxu0 %vm160_vm2, %v5791_v8 }
  0x3b   :  { %4954 = vmatprep.mubr.msk.f32.mxu1 %vm160_vm2, %v5791_v8 }
  0x3d   :  { %67 = vperm.xlu0 %5619, %v59_v5  }
  0x41   :  { %4037 = vperm.xlu0 %5619, %v4023_v6  }
  0x45   :  { %4551 = vperm.xlu0 %5619, %v4548_v7  }
  0xb8   :  { %v63_v9 = vpop.permute.xlu0 %62 }
  0xbc   :  { %v68_v10 = vpop.permute.xlu0 %67 }
 0x10d   :  { %v4949_v11 = vpop.f32.mrb[0].mxu1 }
 0x10e   :  { %v153_v12 = vadd.f32 %v4949_v11, %v68_v10  ;;  %v147_v13 = vpop.f32.mrb[1].mxu1 }
 0x10f   :  { %v148_v14 = vadd.f32 %v147_v13, %v63_v9 }
 0x110   :  { %v157_v15 = vmax.f32 %v153_v12, 0.0 }
 0x111   :  { %v156_v16 = vmax.f32 %v148_v14, 0.0 }
 0x113   :  { %v5371_v17 = vpack.c.bf16 %v157_v15, %v156_v16 }
 0x115   :  { %5372 = vmatprep.subr.bf16.mxu1 %v5371_v17 }
 0x116   :  { %5374 = vmatpush3.bf16.msra.mxu1 %v5371_v17 }
 0x119   :  { %4955 = vmatmul.mubr.msk.f32.vlgmr.msra.gmra.mrb[2].mxu1 %vm160_vm2, %v5797_v18 }
 0x11a   :  { %4961 = vmatprep.mubr.msk.f32.mxu1 %vm160_vm2, %v5791_v8 }
 0x1ec   :  { %v4956_v19 = vpop.f32.mrb[2].mxu1 }
 0x1ed   :  { %v243_v20 = vmax.f32 %v4956_v19, 0.0  ;;  %v233_v21 = vpop.f32.mrb[3].mxu1 }
 0x1ee   :  { %v242_v22 = vmax.f32 %v233_v21, 0.0 }
 0x1f0   :  { %v5375_v23 = vpack.c.bf16 %v243_v20, %v242_v22 }
 0x1f2   :  { %5376 = vmatprep.subr.bf16.mxu1 %v5375_v23 }
 0x1f3   :  { %5378 = vmatpush3.bf16.msra.mxu1 %v5375_v23 }
 0x1f6   :  { %4962 = vmatmul.mubr.msk.f32.vlgmr.msra.gmra.mrb[4].mxu1 %vm160_vm2, %v5797_v18 }
 0x1f7   :  { %4968 = vmatprep.mubr.msk.f32.mxu1 %vm160_vm2, %v5791_v8 }
 0x2c9   :  { %v4963_v24 = vpop.f32.mrb[4].mxu1 }
 0x2ca   :  { %v320_v25 = vmax.f32 %v4963_v24, 0.0  ;;  %v310_v26 = vpop.f32.mrb[5].mxu1 }
 0x2cb   :  { %v319_v27 = vmax.f32 %v310_v26, 0.0 }
 0x2cd   :  { %v5379_v28 = vpack.c.bf16 %v320_v25, %v319_v27 }
 0x2cf   :  { %5380 = vmatprep.subr.bf16.mxu1 %v5379_v28 }
 0x2d0   :  { %5382 = vmatpush3.bf16.msra.mxu1 %v5379_v28 }
 0x2d3   :  { %4969 = vmatmul.mubr.msk.f32.vlgmr.msra.gmra.mrb[6].mxu1 %vm160_vm2, %v5797_v18 }
 0x2d4   :  { %4975 = vmatprep.mubr.msk.f32.mxu1 %vm160_vm2, %v5791_v8 }
 0x3a6   :  { %v4970_v29 = vpop.f32.mrb[6].mxu1 }
 0x3a7   :  { %v397_v30 = vmax.f32 %v4970_v29, 0.0  ;;  %v387_v31 = vpop.f32.mrb[7].mxu1 }
 0x3a8   :  { %v396_v32 = vmax.f32 %v387_v31, 0.0 }
 0x3aa   :  { %v5383_v33 = vpack.c.bf16 %v397_v30, %v396_v32 }
 0x3ac   :  { %5384 = vmatprep.subr.bf16.mxu1 %v5383_v33 }
 0x3ad   :  { %5386 = vmatpush3.bf16.msra.mxu1 %v5383_v33 }
 0x3b0   :  { %4976 = vmatmul.mubr.msk.f32.vlgmr.msra.gmra.mrb[8].mxu1 %vm160_vm2, %v5797_v18 }
 0x3b1   :  { %4982 = vmatprep.mubr.msk.f32.mxu1 %vm160_vm2, %v5791_v8 }
 0x483   :  { %v4977_v34 = vpop.f32.mrb[8].mxu1 }
 0x484   :  { %v474_v35 = vmax.f32 %v4977_v34, 0.0  ;;  %v464_v36 = vpop.f32.mrb[9].mxu1 }
 0x485   :  { %v473_v37 = vmax.f32 %v464_v36, 0.0 }
 0x487   :  { %v5387_v38 = vpack.c.bf16 %v474_v35, %v473_v37 }
 0x489   :  { %5388 = vmatprep.subr.bf16.mxu1 %v5387_v38 }
 0x48a   :  { %5390 = vmatpush3.bf16.msra.mxu1 %v5387_v38 }
 0x48d   :  { %4983 = vmatmul.mubr.msk.f32.vlgmr.msra.gmra.mrb[10].mxu1 %vm160_vm2, %v5797_v18 }
 0x48e   :  { %4989 = vmatprep.mubr.msk.f32.mxu1 %vm160_vm2, %v5791_v8 }
 0x560   :  { %v4984_v39 = vpop.f32.mrb[10].mxu1 }
 0x561   :  { %v551_v40 = vmax.f32 %v4984_v39, 0.0  ;;  %v541_v41 = vpop.f32.mrb[11].mxu1 }
 0x562   :  { %v550_v42 = vmax.f32 %v541_v41, 0.0 }
 0x564   :  { %v5391_v43 = vpack.c.bf16 %v551_v40, %v550_v42 }
 0x566   :  { %5392 = vmatprep.subr.bf16.mxu1 %v5391_v43 }
 0x567   :  { %5394 = vmatpush3.bf16.msra.mxu1 %v5391_v43 }
 0x56a   :  { %4990 = vmatmul.mubr.msk.f32.vlgmr.msra.gmra.mrb[12].mxu1 %vm160_vm2, %v5797_v18 }
 0x56b   :  { %4996 = vmatprep.mubr.msk.f32.mxu1 %vm160_vm2, %v5791_v8 }
 0x63d   :  { %v4991_v44 = vpop.f32.mrb[12].mxu1 }
 0x63e   :  { %v628_v45 = vmax.f32 %v4991_v44, 0.0  ;;  %v618_v46 = vpop.f32.mrb[13].mxu1 }
 0x63f   :  { %v627_v47 = vmax.f32 %v618_v46, 0.0 }
 0x641   :  { %v5395_v48 = vpack.c.bf16 %v628_v45, %v627_v47 }
 0x643   :  { %5396 = vmatprep.subr.bf16.mxu1 %v5395_v48 }
 0x644   :  { %5398 = vmatpush3.bf16.msra.mxu1 %v5395_v48 }
 0x647   :  { %4997 = vmatmul.mubr.msk.f32.vlgmr.msra.gmra.mrb[14].mxu1 %vm160_vm2, %v5797_v18 }
 0x648   :  { %5003 = vmatprep.mubr.msk.f32.mxu1 %vm160_vm2, %v5791_v8 }
 0x71a   :  { %v4998_v49 = vpop.f32.mrb[14].mxu1 }
 0x71b   :  { %v705_v50 = vmax.f32 %v4998_v49, 0.0  ;;  %v695_v51 = vpop.f32.mrb[15].mxu1 }
 0x71c   :  { %v704_v52 = vmax.f32 %v695_v51, 0.0 }
 0x71e   :  { %v5399_v53 = vpack.c.bf16 %v705_v50, %v704_v52 }
 0x720   :  { %5400 = vmatprep.subr.bf16.mxu1 %v5399_v53 }
 0x721   :  { %5402 = vmatpush3.bf16.msra.mxu1 %v5399_v53 }
 0x724   :  { %5004 = vmatmul.mubr.msk.f32.vlgmr.msra.gmra.mrb[16].mxu1 %vm160_vm2, %v5797_v18 }
 0x725   :  { %5010 = vmatprep.mubr.msk.f32.mxu1 %vm160_vm2, %v5791_v8 }
 0x7f7   :  { %v5005_v54 = vpop.f32.mrb[16].mxu1 }
 0x7f8   :  { %v782_v55 = vmax.f32 %v5005_v54, 0.0  ;;  %v772_v56 = vpop.f32.mrb[17].mxu1 }
 0x7f9   :  { %v781_v57 = vmax.f32 %v772_v56, 0.0 }
 0x7fb   :  { %v5403_v58 = vpack.c.bf16 %v782_v55, %v781_v57 }
 0x7fd   :  { %5404 = vmatprep.subr.bf16.mxu1 %v5403_v58 }
 0x7fe   :  { %5406 = vmatpush3.bf16.msra.mxu1 %v5403_v58 }
 0x801   :  { %5011 = vmatmul.mubr.msk.f32.vlgmr.msra.gmra.mrb[18].mxu1 %vm160_vm2, %v5797_v18 }
 0x802   :  { %5017 = vmatprep.mubr.msk.f32.mxu1 %vm160_vm2, %v5791_v8 }
 0x8d4   :  { %v5012_v59 = vpop.f32.mrb[18].mxu1 }
 0x8d5   :  { %v859_v60 = vmax.f32 %v5012_v59, 0.0  ;;  %v849_v61 = vpop.f32.mrb[19].mxu1 }
 0x8d6   :  { %v858_v62 = vmax.f32 %v849_v61, 0.0 }
 0x8d8   :  { %v5407_v63 = vpack.c.bf16 %v859_v60, %v858_v62 }
 0x8da   :  { %5408 = vmatprep.subr.bf16.mxu1 %v5407_v63 }
 0x8db   :  { %5410 = vmatpush3.bf16.msra.mxu1 %v5407_v63 }
 0x8de   :  { %5018 = vmatmul.mubr.msk.f32.vlgmr.msra.gmra.mrb[20].mxu1 %vm160_vm2, %v5797_v18 }
 0x8df   :  { %5024 = vmatprep.mubr.msk.f32.mxu1 %vm160_vm2, %v5791_v8 }
 0x9b1   :  { %v5019_v0 = vpop.f32.mrb[20].mxu1 }
 0x9b2   :  { %v936_v1 = vmax.f32 %v5019_v0, 0.0  ;;  %v926_v2 = vpop.f32.mrb[21].mxu1 }
 0x9b3   :  { %v935_v3 = vmax.f32 %v926_v2, 0.0 }
 0x9b5   :  { %v5411_v4 = vpack.c.bf16 %v936_v1, %v935_v3 }
 0x9b7   :  { %5412 = vmatprep.subr.bf16.mxu1 %v5411_v4 }
 0x9b8   :  { %5414 = vmatpush3.bf16.msra.mxu1 %v5411_v4 }
 0x9bb   :  { %5025 = vmatmul.mubr.msk.f32.vlgmr.msra.gmra.mrb[22].mxu1 %vm160_vm2, %v5797_v18 }
 0x9bc   :  { %5031 = vmatprep.mubr.msk.f32.mxu1 %vm160_vm2, %v5791_v8 }
 0xa8e   :  { %v5026_v5 = vpop.f32.mrb[22].mxu1 }
 0xa8f   :  { %v1013_v6 = vmax.f32 %v5026_v5, 0.0  ;;  %v1003_v7 = vpop.f32.mrb[23].mxu1 }
 0xa90   :  { %v1012_v9 = vmax.f32 %v1003_v7, 0.0 }
 0xa92   :  { %v5415_v10 = vpack.c.bf16 %v1013_v6, %v1012_v9 }
 0xa94   :  { %5416 = vmatprep.subr.bf16.mxu1 %v5415_v10 }
 0xa95   :  { %5418 = vmatpush3.bf16.msra.mxu1 %v5415_v10 }
 0xa98   :  { %5032 = vmatmul.mubr.msk.f32.vlgmr.msra.gmra.mrb[24].mxu1 %vm160_vm2, %v5797_v18 }
 0xa99   :  { %5038 = vmatprep.mubr.msk.f32.mxu1 %vm160_vm2, %v5791_v8 }
 0xb6b   :  { %v5033_v11 = vpop.f32.mrb[24].mxu1 }
 0xb6c   :  { %v1090_v12 = vmax.f32 %v5033_v11, 0.0  ;;  %v1080_v13 = vpop.f32.mrb[25].mxu1 }
 0xb6d   :  { %v1089_v14 = vmax.f32 %v1080_v13, 0.0 }
 0xb6f   :  { %v5419_v15 = vpack.c.bf16 %v1090_v12, %v1089_v14 }
 0xb71   :  { %5420 = vmatprep.subr.bf16.mxu1 %v5419_v15 }
 0xb72   :  { %5422 = vmatpush3.bf16.msra.mxu1 %v5419_v15 }
 0xb75   :  { %5039 = vmatmul.mubr.msk.f32.vlgmr.msra.gmra.mrb[26].mxu1 %vm160_vm2, %v5797_v18 }
 0xb76   :  { %5045 = vmatprep.mubr.msk.f32.mxu1 %vm160_vm2, %v5791_v8 }
 0xc48   :  { %v5040_v16 = vpop.f32.mrb[26].mxu1 }
 0xc49   :  { %v1167_v17 = vmax.f32 %v5040_v16, 0.0  ;;  %v1157_v19 = vpop.f32.mrb[27].mxu1 }
 0xc4a   :  { %v1166_v20 = vmax.f32 %v1157_v19, 0.0 }
 0xc4c   :  { %v5423_v21 = vpack.c.bf16 %v1167_v17, %v1166_v20 }
 0xc4e   :  { %5424 = vmatprep.subr.bf16.mxu1 %v5423_v21 }
 0xc4f   :  { %5426 = vmatpush3.bf16.msra.mxu1 %v5423_v21 }
 0xc52   :  { %5046 = vmatmul.mubr.msk.f32.vlgmr.msra.gmra.mrb[28].mxu1 %vm160_vm2, %v5797_v18 }
 0xc53   :  { %5052 = vmatprep.mubr.msk.f32.mxu1 %vm160_vm2, %v5791_v8 }
 0xd25   :  { %v5047_v22 = vpop.f32.mrb[28].mxu1 }
 0xd26   :  { %v1244_v23 = vmax.f32 %v5047_v22, 0.0  ;;  %v1234_v24 = vpop.f32.mrb[29].mxu1 }
 0xd27   :  { %v1243_v25 = vmax.f32 %v1234_v24, 0.0 }
 0xd29   :  { %v5427_v26 = vpack.c.bf16 %v1244_v23, %v1243_v25 }
 0xd2b   :  { %5428 = vmatprep.subr.bf16.mxu1 %v5427_v26 }
 0xd2c   :  { %5430 = vmatpush3.bf16.msra.mxu1 %v5427_v26 }
 0xd2f   :  { %5053 = vmatmul.mubr.msk.f32.vlgmr.msra.gmra.mrb[30].mxu1 %vm160_vm2, %v5797_v18 }
 0xd30   :  { %5066 = vmatprep.mubr.msk.f32.mxu1 %vm160_vm2, %v5791_v8 }
 0xe02   :  { %v5054_v27 = vpop.f32.mrb[30].mxu1 }
 0xe03   :  { %v1321_v28 = vmax.f32 %v5054_v27, 0.0  ;;  %v1311_v29 = vpop.f32.mrb[31].mxu1 }
 0xe04   :  { %v1320_v30 = vmax.f32 %v1311_v29, 0.0 }
 0xe06   :  { %v5431_v31 = vpack.c.bf16 %v1321_v28, %v1320_v30 }
 0xe08   :  { %5432 = vmatprep.subr.bf16.mxu0 %v5431_v31 }
 0xe09   :  { %5434 = vmatpush3.bf16.msra.mxu0 %v5431_v31 }
 0xe0c   :  { %5060 = vmatmul.mubr.msk.f32.vlgmr.msra.gmra.mrb[0].mxu0 %vm160_vm2, %v5797_v18 }
 0xe0d   :  { %5073 = vmatprep.mubr.msk.f32.mxu0 %vm160_vm2, %v5791_v8 }
 0xedf   :  { %v5061_v32 = vpop.f32.mrb[0].mxu0 }
 0xee0   :  { %v1398_v33 = vmax.f32 %v5061_v32, 0.0  ;;  %v1388_v34 = vpop.f32.mrb[1].mxu0 }
 0xee1   :  { %v1397_v35 = vmax.f32 %v1388_v34, 0.0 }
 0xee3   :  { %v5435_v36 = vpack.c.bf16 %v1398_v33, %v1397_v35 }
 0xee5   :  { %5436 = vmatprep.subr.bf16.mxu1 %v5435_v36 }
 0xee6   :  { %5438 = vmatpush3.bf16.msra.mxu1 %v5435_v36 }
 0xee9   :  { %5067 = vmatmul.mubr.msk.f32.vlgmr.msra.gmra.mrb[32].mxu1 %vm160_vm2, %v5797_v18 }
 0xeea   :  { %5080 = vmatprep.mubr.msk.f32.mxu1 %vm160_vm2, %v5791_v8 }
 0xfbc   :  { %v5068_v37 = vpop.f32.mrb[32].mxu1 }
 0xfbd   :  { %v1475_v38 = vmax.f32 %v5068_v37, 0.0  ;;  %v1465_v39 = vpop.f32.mrb[33].mxu1 }
 0xfbe   :  { %v1474_v40 = vmax.f32 %v1465_v39, 0.0 }
 0xfc0   :  { %v5439_v41 = vpack.c.bf16 %v1475_v38, %v1474_v40 }
 0xfc2   :  { %5440 = vmatprep.subr.bf16.mxu0 %v5439_v41 }
 0xfc3   :  { %5442 = vmatpush3.bf16.msra.mxu0 %v5439_v41 }
 0xfc6   :  { %5074 = vmatmul.mubr.msk.f32.vlgmr.msra.gmra.mrb[2].mxu0 %vm160_vm2, %v5797_v18 }
 0xfc7   :  { %5087 = vmatprep.mubr.msk.f32.mxu0 %vm160_vm2, %v5791_v8 }
0x1099   :  { %v5075_v42 = vpop.f32.mrb[2].mxu0 }
0x109a   :  { %v1552_v43 = vmax.f32 %v5075_v42, 0.0  ;;  %v1542_v44 = vpop.f32.mrb[3].mxu0 }
0x109b   :  { %v1551_v45 = vmax.f32 %v1542_v44, 0.0 }
0x109d   :  { %v5443_v46 = vpack.c.bf16 %v1552_v43, %v1551_v45 }
0x109f   :  { %5444 = vmatprep.subr.bf16.mxu1 %v5443_v46 }
0x10a0   :  { %5446 = vmatpush3.bf16.msra.mxu1 %v5443_v46 }
0x10a3   :  { %5081 = vmatmul.mubr.msk.f32.vlgmr.msra.gmra.mrb[34].mxu1 %vm160_vm2, %v5797_v18 }
0x10a4   :  { %5094 = vmatprep.mubr.msk.f32.mxu1 %vm160_vm2, %v5791_v8 }
0x1176   :  { %v5082_v47 = vpop.f32.mrb[34].mxu1 }
0x1177   :  { %v1629_v48 = vmax.f32 %v5082_v47, 0.0  ;;  %v1619_v49 = vpop.f32.mrb[35].mxu1 }
0x1178   :  { %v1628_v50 = vmax.f32 %v1619_v49, 0.0 }
0x117a   :  { %v5447_v51 = vpack.c.bf16 %v1629_v48, %v1628_v50 }
0x117c   :  { %5448 = vmatprep.subr.bf16.mxu0 %v5447_v51 }
0x117d   :  { %5450 = vmatpush3.bf16.msra.mxu0 %v5447_v51 }
0x1180   :  { %5088 = vmatmul.mubr.msk.f32.vlgmr.msra.gmra.mrb[4].mxu0 %vm160_vm2, %v5797_v18 }
0x1181   :  { %5101 = vmatprep.mubr.msk.f32.mxu0 %vm160_vm2, %v5791_v8 }
0x1253   :  { %v5089_v52 = vpop.f32.mrb[4].mxu0 }
0x1254   :  { %v1706_v53 = vmax.f32 %v5089_v52, 0.0  ;;  %v1696_v54 = vpop.f32.mrb[5].mxu0 }
0x1255   :  { %v1705_v55 = vmax.f32 %v1696_v54, 0.0 }
0x1257   :  { %v5451_v56 = vpack.c.bf16 %v1706_v53, %v1705_v55 }
0x1259   :  { %5452 = vmatprep.subr.bf16.mxu1 %v5451_v56 }
0x125a   :  { %5454 = vmatpush3.bf16.msra.mxu1 %v5451_v56 }
0x125d   :  { %5095 = vmatmul.mubr.msk.f32.vlgmr.msra.gmra.mrb[36].mxu1 %vm160_vm2, %v5797_v18 }
0x125e   :  { %5108 = vmatprep.mubr.msk.f32.mxu1 %vm160_vm2, %v5791_v8 }
0x1330   :  { %v5096_v57 = vpop.f32.mrb[36].mxu1 }
0x1331   :  { %v1783_v58 = vmax.f32 %v5096_v57, 0.0  ;;  %v1773_v59 = vpop.f32.mrb[37].mxu1 }
0x1332   :  { %v1782_v60 = vmax.f32 %v1773_v59, 0.0 }
0x1334   :  { %v5455_v61 = vpack.c.bf16 %v1783_v58, %v1782_v60 }
0x1336   :  { %5456 = vmatprep.subr.bf16.mxu0 %v5455_v61 }
0x1337   :  { %5458 = vmatpush3.bf16.msra.mxu0 %v5455_v61 }
0x133a   :  { %5102 = vmatmul.mubr.msk.f32.vlgmr.msra.gmra.mrb[6].mxu0 %vm160_vm2, %v5797_v18 }
0x133b   :  { %5115 = vmatprep.mubr.msk.f32.mxu0 %vm160_vm2, %v5791_v8 }
0x140d   :  { %v5103_v62 = vpop.f32.mrb[6].mxu0 }
0x140e   :  { %v1860_v63 = vmax.f32 %v5103_v62, 0.0  ;;  %v1850_v0 = vpop.f32.mrb[7].mxu0 }
0x140f   :  { %v1859_v1 = vmax.f32 %v1850_v0, 0.0 }
0x1411   :  { %v5459_v2 = vpack.c.bf16 %v1860_v63, %v1859_v1 }
0x1413   :  { %5460 = vmatprep.subr.bf16.mxu1 %v5459_v2 }
0x1414   :  { %5462 = vmatpush3.bf16.msra.mxu1 %v5459_v2 }
0x1417   :  { %5109 = vmatmul.mubr.msk.f32.vlgmr.msra.gmra.mrb[38].mxu1 %vm160_vm2, %v5797_v18 }
0x1418   :  { %5122 = vmatprep.mubr.msk.f32.mxu1 %vm160_vm2, %v5791_v8 }
0x14ea   :  { %v5110_v3 = vpop.f32.mrb[38].mxu1 }
0x14eb   :  { %v1937_v4 = vmax.f32 %v5110_v3, 0.0  ;;  %v1927_v5 = vpop.f32.mrb[39].mxu1 }
0x14ec   :  { %v1936_v6 = vmax.f32 %v1927_v5, 0.0 }
0x14ee   :  { %v5463_v7 = vpack.c.bf16 %v1937_v4, %v1936_v6 }
0x14f0   :  { %5464 = vmatprep.subr.bf16.mxu0 %v5463_v7 }
0x14f1   :  { %5466 = vmatpush3.bf16.msra.mxu0 %v5463_v7 }
0x14f4   :  { %5116 = vmatmul.mubr.msk.f32.vlgmr.msra.gmra.mrb[8].mxu0 %vm160_vm2, %v5797_v18 }
0x14f5   :  { %5129 = vmatprep.mubr.msk.f32.mxu0 %vm160_vm2, %v5791_v8 }
0x15c7   :  { %v5117_v9 = vpop.f32.mrb[8].mxu0 }
0x15c8   :  { %v2014_v10 = vmax.f32 %v5117_v9, 0.0  ;;  %v2004_v11 = vpop.f32.mrb[9].mxu0 }
0x15c9   :  { %v2013_v12 = vmax.f32 %v2004_v11, 0.0 }
0x15cb   :  { %v5467_v13 = vpack.c.bf16 %v2014_v10, %v2013_v12 }
0x15cd   :  { %5468 = vmatprep.subr.bf16.mxu1 %v5467_v13 }
0x15ce   :  { %5470 = vmatpush3.bf16.msra.mxu1 %v5467_v13 }
0x15d1   :  { %5123 = vmatmul.mubr.msk.f32.vlgmr.msra.gmra.mrb[40].mxu1 %vm160_vm2, %v5797_v18 }
0x15d2   :  { %5136 = vmatprep.mubr.msk.f32.mxu1 %vm160_vm2, %v5791_v8 }
0x16a4   :  { %v5124_v14 = vpop.f32.mrb[40].mxu1 }
0x16a5   :  { %v2091_v15 = vmax.f32 %v5124_v14, 0.0  ;;  %v2081_v16 = vpop.f32.mrb[41].mxu1 }
0x16a6   :  { %v2090_v17 = vmax.f32 %v2081_v16, 0.0 }
0x16a8   :  { %v5471_v19 = vpack.c.bf16 %v2091_v15, %v2090_v17 }
0x16aa   :  { %5472 = vmatprep.subr.bf16.mxu0 %v5471_v19 }
0x16ab   :  { %5474 = vmatpush3.bf16.msra.mxu0 %v5471_v19 }
0x16ae   :  { %5130 = vmatmul.mubr.msk.f32.vlgmr.msra.gmra.mrb[10].mxu0 %vm160_vm2, %v5797_v18 }
0x16af   :  { %5143 = vmatprep.mubr.msk.f32.mxu0 %vm160_vm2, %v5791_v8 }
0x1781   :  { %v5131_v20 = vpop.f32.mrb[10].mxu0 }
0x1782   :  { %v2168_v21 = vmax.f32 %v5131_v20, 0.0  ;;  %v2158_v22 = vpop.f32.mrb[11].mxu0 }
0x1783   :  { %v2167_v23 = vmax.f32 %v2158_v22, 0.0 }
0x1785   :  { %v5475_v24 = vpack.c.bf16 %v2168_v21, %v2167_v23 }
0x1787   :  { %5476 = vmatprep.subr.bf16.mxu1 %v5475_v24 }
0x1788   :  { %5478 = vmatpush3.bf16.msra.mxu1 %v5475_v24 }
0x178b   :  { %5137 = vmatmul.mubr.msk.f32.vlgmr.msra.gmra.mrb[42].mxu1 %vm160_vm2, %v5797_v18 }
0x178c   :  { %5150 = vmatprep.mubr.msk.f32.mxu1 %vm160_vm2, %v5791_v8 }
0x185e   :  { %v5138_v25 = vpop.f32.mrb[42].mxu1 }
0x185f   :  { %v2245_v26 = vmax.f32 %v5138_v25, 0.0  ;;  %v2235_v27 = vpop.f32.mrb[43].mxu1 }
0x1860   :  { %v2244_v28 = vmax.f32 %v2235_v27, 0.0 }
0x1862   :  { %v5479_v29 = vpack.c.bf16 %v2245_v26, %v2244_v28 }
0x1864   :  { %5480 = vmatprep.subr.bf16.mxu0 %v5479_v29 }
0x1865   :  { %5482 = vmatpush3.bf16.msra.mxu0 %v5479_v29 }
0x1868   :  { %5144 = vmatmul.mubr.msk.f32.vlgmr.msra.gmra.mrb[12].mxu0 %vm160_vm2, %v5797_v18 }
0x1869   :  { %5157 = vmatprep.mubr.msk.f32.mxu0 %vm160_vm2, %v5791_v8 }
0x193b   :  { %v5145_v30 = vpop.f32.mrb[12].mxu0 }
0x193c   :  { %v2322_v31 = vmax.f32 %v5145_v30, 0.0  ;;  %v2312_v32 = vpop.f32.mrb[13].mxu0 }
0x193d   :  { %v2321_v33 = vmax.f32 %v2312_v32, 0.0 }
0x193f   :  { %v5483_v34 = vpack.c.bf16 %v2322_v31, %v2321_v33 }
0x1941   :  { %5484 = vmatprep.subr.bf16.mxu1 %v5483_v34 }
0x1942   :  { %5486 = vmatpush3.bf16.msra.mxu1 %v5483_v34 }
0x1945   :  { %5151 = vmatmul.mubr.msk.f32.vlgmr.msra.gmra.mrb[44].mxu1 %vm160_vm2, %v5797_v18 }
0x1946   :  { %5164 = vmatprep.mubr.msk.f32.mxu1 %vm160_vm2, %v5791_v8 }
0x1a18   :  { %v5152_v35 = vpop.f32.mrb[44].mxu1 }
0x1a19   :  { %v2399_v36 = vmax.f32 %v5152_v35, 0.0  ;;  %v2389_v37 = vpop.f32.mrb[45].mxu1 }
0x1a1a   :  { %v2398_v38 = vmax.f32 %v2389_v37, 0.0 }
0x1a1c   :  { %v5487_v39 = vpack.c.bf16 %v2399_v36, %v2398_v38 }
0x1a1e   :  { %5488 = vmatprep.subr.bf16.mxu0 %v5487_v39 }
0x1a1f   :  { %5490 = vmatpush3.bf16.msra.mxu0 %v5487_v39 }
0x1a22   :  { %5158 = vmatmul.mubr.msk.f32.vlgmr.msra.gmra.mrb[14].mxu0 %vm160_vm2, %v5797_v18 }
0x1a23   :  { %5171 = vmatprep.mubr.msk.f32.mxu0 %vm160_vm2, %v5791_v8 }
0x1af5   :  { %v5159_v40 = vpop.f32.mrb[14].mxu0 }
0x1af6   :  { %v2476_v41 = vmax.f32 %v5159_v40, 0.0  ;;  %v2466_v42 = vpop.f32.mrb[15].mxu0 }
0x1af7   :  { %v2475_v43 = vmax.f32 %v2466_v42, 0.0 }
0x1af9   :  { %v5491_v44 = vpack.c.bf16 %v2476_v41, %v2475_v43 }
0x1afb   :  { %5492 = vmatprep.subr.bf16.mxu1 %v5491_v44 }
0x1afc   :  { %5494 = vmatpush3.bf16.msra.mxu1 %v5491_v44 }
0x1aff   :  { %5165 = vmatmul.mubr.msk.f32.vlgmr.msra.gmra.mrb[46].mxu1 %vm160_vm2, %v5797_v18 }
0x1b00   :  { %5178 = vmatprep.mubr.msk.f32.mxu1 %vm160_vm2, %v5791_v8 }
0x1bd2   :  { %v5166_v45 = vpop.f32.mrb[46].mxu1 }
0x1bd3   :  { %v2553_v46 = vmax.f32 %v5166_v45, 0.0  ;;  %v2543_v47 = vpop.f32.mrb[47].mxu1 }
0x1bd4   :  { %v2552_v48 = vmax.f32 %v2543_v47, 0.0 }
0x1bd6   :  { %v5495_v49 = vpack.c.bf16 %v2553_v46, %v2552_v48 }
0x1bd8   :  { %5496 = vmatprep.subr.bf16.mxu0 %v5495_v49 }
0x1bd9   :  { %5498 = vmatpush3.bf16.msra.mxu0 %v5495_v49 }
0x1bdc   :  { %5172 = vmatmul.mubr.msk.f32.vlgmr.msra.gmra.mrb[16].mxu0 %vm160_vm2, %v5797_v18 }
0x1bdd   :  { %5185 = vmatprep.mubr.msk.f32.mxu0 %vm160_vm2, %v5791_v8 }
0x1caf   :  { %v5173_v50 = vpop.f32.mrb[16].mxu0 }
0x1cb0   :  { %v2630_v51 = vmax.f32 %v5173_v50, 0.0  ;;  %v2620_v52 = vpop.f32.mrb[17].mxu0 }
0x1cb1   :  { %v2629_v53 = vmax.f32 %v2620_v52, 0.0 }
0x1cb3   :  { %v5499_v54 = vpack.c.bf16 %v2630_v51, %v2629_v53 }
0x1cb5   :  { %5500 = vmatprep.subr.bf16.mxu1 %v5499_v54 }
0x1cb6   :  { %5502 = vmatpush3.bf16.msra.mxu1 %v5499_v54 }
0x1cb9   :  { %5179 = vmatmul.mubr.msk.f32.vlgmr.msra.gmra.mrb[48].mxu1 %vm160_vm2, %v5797_v18 }
0x1cba   :  { %5192 = vmatprep.mubr.msk.f32.mxu1 %vm160_vm2, %v5791_v8 }
0x1d8c   :  { %v5180_v55 = vpop.f32.mrb[48].mxu1 }
0x1d8d   :  { %v2707_v56 = vmax.f32 %v5180_v55, 0.0  ;;  %v2697_v57 = vpop.f32.mrb[49].mxu1 }
0x1d8e   :  { %v2706_v58 = vmax.f32 %v2697_v57, 0.0 }
0x1d90   :  { %v5503_v59 = vpack.c.bf16 %v2707_v56, %v2706_v58 }
0x1d92   :  { %5504 = vmatprep.subr.bf16.mxu0 %v5503_v59 }
0x1d93   :  { %5506 = vmatpush3.bf16.msra.mxu0 %v5503_v59 }
0x1d96   :  { %5186 = vmatmul.mubr.msk.f32.vlgmr.msra.gmra.mrb[18].mxu0 %vm160_vm2, %v5797_v18 }
0x1d97   :  { %5199 = vmatprep.mubr.msk.f32.mxu0 %vm160_vm2, %v5791_v8 }
0x1e69   :  { %v5187_v60 = vpop.f32.mrb[18].mxu0 }
0x1e6a   :  { %v2784_v61 = vmax.f32 %v5187_v60, 0.0  ;;  %v2774_v62 = vpop.f32.mrb[19].mxu0 }
0x1e6b   :  { %v2783_v63 = vmax.f32 %v2774_v62, 0.0 }
0x1e6d   :  { %v5507_v0 = vpack.c.bf16 %v2784_v61, %v2783_v63 }
0x1e6f   :  { %5508 = vmatprep.subr.bf16.mxu1 %v5507_v0 }
0x1e70   :  { %5510 = vmatpush3.bf16.msra.mxu1 %v5507_v0 }
0x1e73   :  { %5193 = vmatmul.mubr.msk.f32.vlgmr.msra.gmra.mrb[50].mxu1 %vm160_vm2, %v5797_v18 }
0x1e74   :  { %5206 = vmatprep.mubr.msk.f32.mxu1 %vm160_vm2, %v5791_v8 }
0x1f46   :  { %v5194_v1 = vpop.f32.mrb[50].mxu1 }
0x1f47   :  { %v2861_v2 = vmax.f32 %v5194_v1, 0.0  ;;  %v2851_v3 = vpop.f32.mrb[51].mxu1 }
0x1f48   :  { %v2860_v4 = vmax.f32 %v2851_v3, 0.0 }
0x1f4a   :  { %v5511_v5 = vpack.c.bf16 %v2861_v2, %v2860_v4 }
0x1f4c   :  { %5512 = vmatprep.subr.bf16.mxu0 %v5511_v5 }
0x1f4d   :  { %5514 = vmatpush3.bf16.msra.mxu0 %v5511_v5 }
0x1f50   :  { %5200 = vmatmul.mubr.msk.f32.vlgmr.msra.gmra.mrb[20].mxu0 %vm160_vm2, %v5797_v18 }
0x1f51   :  { %5213 = vmatprep.mubr.msk.f32.mxu0 %vm160_vm2, %v5791_v8 }
0x2023   :  { %v5201_v6 = vpop.f32.mrb[20].mxu0 }
0x2024   :  { %v2938_v7 = vmax.f32 %v5201_v6, 0.0  ;;  %v2928_v9 = vpop.f32.mrb[21].mxu0 }
0x2025   :  { %v2937_v10 = vmax.f32 %v2928_v9, 0.0 }
0x2027   :  { %v5515_v11 = vpack.c.bf16 %v2938_v7, %v2937_v10  ;;  %v4144_v10 = vlaneseq }
0x2029   :  { %5516 = vmatprep.subr.bf16.mxu1 %v5515_v11 }
0x202a   :  { %5518 = vmatpush3.bf16.msra.mxu1 %v5515_v11  ;;  %v5993_v11 = vshrl.u32 %v4144_v10, 7 }
0x202d   :  { %5207 = vmatmul.mubr.msk.f32.vlgmr.msra.gmra.mrb[52].mxu1 %vm160_vm2, %v5797_v18 }
0x202e   :  { %5220 = vmatprep.mubr.msk.f32.mxu1 %vm160_vm2, %v5791_v8 }
0x2100   :  { %v5208_v12 = vpop.f32.mrb[52].mxu1 }
0x2101   :  { %v3015_v13 = vmax.f32 %v5208_v12, 0.0  ;;  %v3005_v14 = vpop.f32.mrb[53].mxu1  ;;  %v5996_v12 = vadd.s32 8, %v5993_v11 }
0x2102   :  { %v3014_v15 = vmax.f32 %v3005_v14, 0.0 }
0x2104   :  { %v5519_v16 = vpack.c.bf16 %v3015_v13, %v3014_v15 }
0x2106   :  { %5520 = vmatprep.subr.bf16.mxu0 %v5519_v16 }
0x2107   :  { %5522 = vmatpush3.bf16.msra.mxu0 %v5519_v16  ;;  %v4148_v16 = vcvt.s32.f32 %v5996_v12 }
0x210a   :  { %5214 = vmatmul.mubr.msk.f32.vlgmr.msra.gmra.mrb[22].mxu0 %vm160_vm2, %v5797_v18 }
0x210b   :  { %5227 = vmatprep.mubr.msk.f32.mxu0 %vm160_vm2, %v5791_v8 }
0x21dd   :  { %v5215_v17 = vpop.f32.mrb[22].mxu0 }
0x21de   :  { %v3092_v19 = vmax.f32 %v5215_v17, 0.0  ;;  %v3082_v20 = vpop.f32.mrb[23].mxu0 }
0x21df   :  { %v3091_v21 = vmax.f32 %v3082_v20, 0.0 }
0x21e1   :  { %v5523_v22 = vpack.c.bf16 %v3092_v19, %v3091_v21  ;;  %v4679_v19 = vld [vmem:[%s6089_s2] ss:$0 sm:$0xff]  ;;  %v5721_v21 = vmov 0.0|0.0  }
0x21e2   :  { %vm4154_vm4 = vcmp.eq.f32.partialorder %v4148_v16, %v4679_v19 }
0x21e3   :  { %5524 = vmatprep.subr.bf16.mxu1 %v5523_v22 }
0x21e4   :  { %5526 = vmatpush3.bf16.msra.mxu1 %v5523_v22  ;;  %v5722_v22 = vmov 1.0|1.0  }
0x21e7   :  { %5221 = vmatmul.mubr.msk.f32.vlgmr.msra.gmra.mrb[54].mxu1 %vm160_vm2, %v5797_v18 }
0x21e8   :  { %5234 = vmatprep.mubr.msk.f32.mxu1 %vm160_vm2, %v5791_v8 }
0x22ba   :  { %v5222_v23 = vpop.f32.mrb[54].mxu1 }
0x22bb   :  { %v3169_v24 = vmax.f32 %v5222_v23, 0.0  ;;  %v3159_v25 = vpop.f32.mrb[55].mxu1  ;;  %v5724_v23 = vmov 0.0  }
0x22bc   :  { %v3168_v26 = vmax.f32 %v3159_v25, 0.0  ;;  %v4017_v25 = vld [vmem:[#allocation7 + $0x30] sm:$0xff] }
0x22be   :  { %v5527_v27 = vpack.c.bf16 %v3169_v24, %v3168_v26  ;;  %v4157_v24 = vld [vmem:[#allocation5] sm:$0xf]  ;;  %v4231_v26 = vld [vmem:[#allocation7 + $0x70] sm:$0xff] }
0x22c0   :  { %5528 = vmatprep.subr.bf16.mxu0 %v5527_v27 }
0x22c1   :  { %5530 = vmatpush3.bf16.msra.mxu0 %v5527_v27  ;;  %v4021_v27 = vld [vmem:[#allocation7 + $0x50] sm:$0xff] }
0x22c2   :  { %4027 = vperm.xlu1 %5620, %v4021_v27  }
0x22c4   :  { %5228 = vmatmul.mubr.msk.f32.vlgmr.msra.gmra.mrb[24].mxu0 %vm160_vm2, %v5797_v18 }
0x22c5   :  { %5241 = vmatprep.mubr.msk.f32.mxu0 %vm160_vm2, %v5791_v8 }
0x2397   :  { %v5229_v28 = vpop.f32.mrb[24].mxu0 }
0x2398   :  { %v3246_v29 = vmax.f32 %v5229_v28, 0.0  ;;  %v3236_v30 = vpop.f32.mrb[25].mxu0  ;;  %v4022_v28 = vld [vmem:[#allocation7 + $0x58] sm:$0xff] }
0x2399   :  { %v3245_v31 = vmax.f32 %v3236_v30, 0.0  ;;  %4032 = vperm.xlu1 %5620, %v4022_v28  }
0x239b   :  { %v5531_v32 = vpack.c.bf16 %v3246_v29, %v3245_v31 }
0x239d   :  { %5532 = vmatprep.subr.bf16.mxu1 %v5531_v32 }
0x239e   :  { %5534 = vmatpush3.bf16.msra.mxu1 %v5531_v32 }
0x23a1   :  { %5235 = vmatmul.mubr.msk.f32.vlgmr.msra.gmra.mrb[56].mxu1 %vm160_vm2, %v5797_v18 }
0x23a2   :  { %5248 = vmatprep.mubr.msk.f32.mxu1 %vm160_vm2, %v5791_v8 }
0x2474   :  { %v5236_v33 = vpop.f32.mrb[56].mxu1 }
0x2475   :  { %v3323_v34 = vmax.f32 %v5236_v33, 0.0  ;;  %v3313_v35 = vpop.f32.mrb[57].mxu1 }
0x2476   :  { %v3322_v36 = vmax.f32 %v3313_v35, 0.0  ;;  %v4232_v35 = vld [vmem:[#allocation7 + $0x78] sm:$0xff] }
0x2478   :  { %v5535_v37 = vpack.c.bf16 %v3323_v34, %v3322_v36 }
0x247a   :  { %5536 = vmatprep.subr.bf16.mxu0 %v5535_v37 }
0x247b   :  { %5538 = vmatpush3.bf16.msra.mxu0 %v5535_v37  ;;  %v4233_v37 = vld [vmem:[#allocation7 + $0x80] sm:$0xff] }
0x247e   :  { %5242 = vmatmul.mubr.msk.f32.vlgmr.msra.gmra.mrb[26].mxu0 %vm160_vm2, %v5797_v18 }
0x247f   :  { %5255 = vmatprep.mubr.msk.f32.mxu0 %vm160_vm2, %v5791_v8 }
0x2551   :  { %v5243_v38 = vpop.f32.mrb[26].mxu0 }
0x2552   :  { %v3400_v39 = vmax.f32 %v5243_v38, 0.0  ;;  %v3390_v40 = vpop.f32.mrb[27].mxu0  ;;  %v4018_v38 = vld [vmem:[#allocation7 + $0x38] sm:$0xff] }
0x2553   :  { %v3399_v41 = vmax.f32 %v3390_v40, 0.0  ;;  %v4234_v40 = vld [vmem:[#allocation7 + $0x88] sm:$0xff] }
0x2555   :  { %v5539_v42 = vpack.c.bf16 %v3400_v39, %v3399_v41  ;;  %v4019_v39 = vld [vmem:[#allocation7 + $0x40] sm:$0xff]  ;;  %v4020_v41 = vld [vmem:[#allocation7 + $0x48] sm:$0xff] }
0x2557   :  { %5540 = vmatprep.subr.bf16.mxu1 %v5539_v42 }
0x2558   :  { %5542 = vmatpush3.bf16.msra.mxu1 %v5539_v42  ;;  %v6026_v42 = vld [vmem:[%s6089_s2 + $0x1] ss:$0 sm:$0xff]  ;;  %s5725_s2 = smov [#allocation8]  }
0x2559   :  { %vm4447_vm8 = vcmp.eq.f32.partialorder %v4148_v16, %v6026_v42  ;;  %s4562_s28 = sshll.u32 %s5725_s2, 4  ;;  %s4563_s28 = int_to_ptr.vmem [resolvable:$true] %s4562_s28 }
0x255a   :  { %s5687_s29 = scalar_lea.vmem %s4563_s28, 128  ;;  %p5692_p11 = scmp.lt.s32.totalorder %s4563_s28, %s4563_s28 }
0x255b   :  { %5249 = vmatmul.mubr.msk.f32.vlgmr.msra.gmra.mrb[58].mxu1 %vm160_vm2, %v5797_v18  ;;  %p5688_p10 = scmp.ne.s32.totalorder %s4563_s28, %s5687_s29  ;;  %p5693_p12 = scmp.lt.s32.totalorder %s5687_s29, %s5687_s29 }
0x255c   :  { %5262 = vmatprep.mubr.msk.f32.mxu1 %vm160_vm2, %v5791_v8 }
0x255d   :  { %p5694_p13 = por %p5693_p12, %p5692_p11 }
0x255f   :  { %p5695_p0 = pnand %p5694_p13, %p5688_p10 }
0x262e   :  { %v5250_v43 = vpop.f32.mrb[58].mxu1 }
0x262f   :  { %v3477_v44 = vmax.f32 %v5250_v43, 0.0  ;;  %v3467_v45 = vpop.f32.mrb[59].mxu1  ;;  %v4414_v43 = vadd.s32 16, %v5993_v11 }
0x2630   :  { %v3476_v46 = vmax.f32 %v3467_v45, 0.0 }
0x2631   :  { %v4428_v45 = vcvt.s32.f32 %v4414_v43 }
0x2632   :  { %v5543_v47 = vpack.c.bf16 %v3477_v44, %v3476_v46  ;;  %v4415_v44 = vadd.s32 24, %v5993_v11 }
0x2633   :  { %vm4448_vm10 = vcmp.eq.f32.partialorder %v4428_v45, %v6026_v42 }
0x2634   :  { %5544 = vmatprep.subr.bf16.mxu0 %v5543_v47  ;;  %v4429_v46 = vcvt.s32.f32 %v4415_v44 }
0x2635   :  { %5546 = vmatpush3.bf16.msra.mxu0 %v5543_v47  ;;  %v4416_v47 = vadd.s32 32, %v5993_v11 }
0x2636   :  { %vm4449_vm11 = vcmp.eq.f32.partialorder %v4429_v46, %v6026_v42 }
0x2637   :  { %vm5588_vm12 = vmpackc.low %vm4449_vm11, %vm4448_vm10 }
0x2638   :  { %5256 = vmatmul.mubr.msk.f32.vlgmr.msra.gmra.mrb[28].mxu0 %vm160_vm2, %v5797_v18 }
0x2639   :  { %5269 = vmatprep.mubr.msk.f32.mxu0 %vm160_vm2, %v5791_v8 }
0x270b   :  { %v5257_v48 = vpop.f32.mrb[28].mxu0 }
0x270c   :  { %v3554_v49 = vmax.f32 %v5257_v48, 0.0  ;;  %v3544_v50 = vpop.f32.mrb[29].mxu0  ;;  %v4417_v48 = vadd.s32 40, %v5993_v11 }
0x270d   :  { %v3553_v51 = vmax.f32 %v3544_v50, 0.0 }
0x270e   :  { %v4431_v50 = vcvt.s32.f32 %v4417_v48 }
0x270f   :  { %v5547_v52 = vpack.c.bf16 %v3554_v49, %v3553_v51  ;;  %v4430_v49 = vcvt.s32.f32 %v4416_v47  ;;  %v4418_v51 = vadd.s32 48, %v5993_v11 }
0x2710   :  { %vm4451_vm14 = vcmp.eq.f32.partialorder %v4431_v50, %v6026_v42 }
0x2711   :  { %5548 = vmatprep.subr.bf16.mxu1 %v5547_v52  ;;  %vm4450_vm13 = vcmp.eq.f32.partialorder %v4430_v49, %v6026_v42 }
0x2712   :  { %5550 = vmatpush3.bf16.msra.mxu1 %v5547_v52  ;;  %v4419_v52 = vadd.s32 56, %v5993_v11  ;;  %vm5591_vm15 = vmpackc.low %vm4451_vm14, %vm4450_vm13 }
0x2715   :  { %5263 = vmatmul.mubr.msk.f32.vlgmr.msra.gmra.mrb[60].mxu1 %vm160_vm2, %v5797_v18 }
0x2716   :  { %5276 = vmatprep.mubr.msk.f32.mxu1 %vm160_vm2, %v5791_v8 }
0x27e8   :  { %v5264_v53 = vpop.f32.mrb[60].mxu1 }
0x27e9   :  { %v3631_v54 = vmax.f32 %v5264_v53, 0.0  ;;  %v3621_v55 = vpop.f32.mrb[61].mxu1  ;;  %v4432_v53 = vcvt.s32.f32 %v4418_v51 }
0x27ea   :  { %v3630_v56 = vmax.f32 %v3621_v55, 0.0  ;;  %v4420_v55 = vadd.s32 64, %v5993_v11 }
0x27ec   :  { %v5551_v57 = vpack.c.bf16 %v3631_v54, %v3630_v56  ;;  %v4433_v54 = vcvt.s32.f32 %v4419_v52  ;;  %v4421_v56 = vadd.s32 72, %v5993_v11 }
0x27ee   :  { %5552 = vmatprep.subr.bf16.mxu0 %v5551_v57 }
0x27ef   :  { %5554 = vmatpush3.bf16.msra.mxu0 %v5551_v57  ;;  %v4434_v57 = vcvt.s32.f32 %v4420_v55 }
0x27f2   :  { %5270 = vmatmul.mubr.msk.f32.vlgmr.msra.gmra.mrb[30].mxu0 %vm160_vm2, %v5797_v18 }
0x27f3   :  { %5283 = vmatprep.mubr.msk.f32.mxu0 %vm160_vm2, %v5791_v8 }
0x28c5   :  { %v5271_v58 = vpop.f32.mrb[30].mxu0 }
0x28c6   :  { %v3708_v59 = vmax.f32 %v5271_v58, 0.0  ;;  %v3698_v60 = vpop.f32.mrb[31].mxu0  ;;  %v4435_v58 = vcvt.s32.f32 %v4421_v56 }
0x28c7   :  { %v3707_v61 = vmax.f32 %v3698_v60, 0.0  ;;  %v4423_v60 = vadd.s32 88, %v5993_v11 }
0x28c9   :  { %v5555_v62 = vpack.c.bf16 %v3708_v59, %v3707_v61  ;;  %v4422_v59 = vadd.s32 80, %v5993_v11 }
0x28cb   :  { %5556 = vmatprep.subr.bf16.mxu1 %v5555_v62  ;;  %v4436_v61 = vcvt.s32.f32 %v4422_v59 }
0x28cc   :  { %5558 = vmatpush3.bf16.msra.mxu1 %v5555_v62  ;;  %v4437_v62 = vcvt.s32.f32 %v4423_v60 }
0x28cf   :  { %5277 = vmatmul.mubr.msk.f32.vlgmr.msra.gmra.mrb[62].mxu1 %vm160_vm2, %v5797_v18 }
0x28d0   :  { %5290 = vmatprep.mubr.msk.f32.mxu1 %vm160_vm2, %v5791_v8 }
0x29a2   :  { %v5278_v63 = vpop.f32.mrb[62].mxu1 }
0x29a3   :  { %v3785_v0 = vmax.f32 %v5278_v63, 0.0  ;;  %v3775_v1 = vpop.f32.mrb[63].mxu1  ;;  %v4424_v63 = vadd.s32 96, %v5993_v11 }
0x29a4   :  { %v3784_v2 = vmax.f32 %v3775_v1, 0.0 }
0x29a5   :  { %v4438_v1 = vcvt.s32.f32 %v4424_v63 }
0x29a6   :  { %v5559_v3 = vpack.c.bf16 %v3785_v0, %v3784_v2  ;;  %v4425_v0 = vadd.s32 104, %v5993_v11 }
0x29a7   :  { %vm4458_vm10 = vcmp.eq.f32.partialorder %v4438_v1, %v6026_v42 }
0x29a8   :  { %5560 = vmatprep.subr.bf16.mxu0 %v5559_v3  ;;  %v4439_v2 = vcvt.s32.f32 %v4425_v0 }
0x29a9   :  { %5562 = vmatpush3.bf16.msra.mxu0 %v5559_v3  ;;  %v4426_v3 = vadd.s32 112, %v5993_v11 }
0x29aa   :  { %vm4459_vm11 = vcmp.eq.f32.partialorder %v4439_v2, %v6026_v42 }
0x29ac   :  { %5284 = vmatmul.mubr.msk.f32.vlgmr.msra.gmra.mrb[32].mxu0 %vm160_vm2, %v5797_v18 }
0x29ad   :  { %5297 = vmatprep.mubr.msk.f32.mxu0 %vm160_vm2, %v5791_v8  ;;  %v4147_v8 = vcvt.s32.f32 %v5993_v11 }
0x29af   :  { %vm4153_vm3 = vcmp.eq.f32.partialorder %v4147_v8, %v4679_v19  ;;  %vm4446_vm7 = vcmp.eq.f32.partialorder %v4147_v8, %v6026_v42 }
0x29b0   :  { %vm5576_vm5 = vmpackc.low %vm4154_vm4, %vm4153_vm3  ;;  %vm4454_vm4 = vcmp.eq.f32.partialorder %v4434_v57, %v6026_v42 }
0x29b1   :  { %vm5585_vm9 = vmpackc.low %vm4447_vm8, %vm4446_vm7  ;;  %vm4456_vm7 = vcmp.eq.f32.partialorder %v4436_v61, %v6026_v42  ;;  %vm4457_vm8 = vcmp.eq.f32.partialorder %v4437_v62, %v6026_v42 }
0x2a7f   :  { %v5285_v4 = vpop.f32.mrb[32].mxu0 }
0x2a80   :  { %v3862_v5 = vmax.f32 %v5285_v4, 0.0  ;;  %v3852_v6 = vpop.f32.mrb[33].mxu0  ;;  %v4427_v4 = vadd.s32 120, %v5993_v11 }
0x2a81   :  { %v3861_v7 = vmax.f32 %v3852_v6, 0.0 }
0x2a82   :  { %v4441_v6 = vcvt.s32.f32 %v4427_v4 }
0x2a83   :  { %v5563_v9 = vpack.c.bf16 %v3862_v5, %v3861_v7  ;;  %v4440_v5 = vcvt.s32.f32 %v4426_v3  ;;  %v4028_v7 = vpop.permute.xlu1 %4027 }
0x2a84   :  { %vm4461_vm14 = vcmp.eq.f32.partialorder %v4441_v6, %v6026_v42 }
0x2a85   :  { %5564 = vmatprep.subr.bf16.mxu1 %v5563_v9  ;;  %vm4460_vm13 = vcmp.eq.f32.partialorder %v4440_v5, %v6026_v42 }
0x2a86   :  { %5566 = vmatpush3.bf16.msra.mxu1 %v5563_v9 }
0x2a87   :  { %v4033_v10 = vpop.permute.xlu1 %4032 }
0x2a89   :  { %5291 = vmatmul.mubr.msk.f32.vlgmr.msra.gmra.mrb[64].mxu1 %vm160_vm2, %v5797_v18 }
0x2a8a   :  { %5304 = vmatprep.mubr.msk.f32.mxu1 %vm160_vm2, %v4017_v25 }
0x2b5c   :  { %v5292_v13 = vpop.f32.mrb[64].mxu1 }
0x2b5d   :  { %v3939_v14 = vmax.f32 %v5292_v13, 0.0  ;;  %v3929_v15 = vpop.f32.mrb[65].mxu1 }
0x2b5e   :  { %v3938_v17 = vmax.f32 %v3929_v15, 0.0 }
0x2b60   :  { %v5567_v20 = vpack.c.bf16 %v3939_v14, %v3938_v17 }
0x2b62   :  { %5568 = vmatprep.subr.bf16.mxu0 %v5567_v20 }
0x2b63   :  { %5570 = vmatpush3.bf16.msra.mxu0 %v5567_v20 }
0x2b64   :  { %5575 = vmatprep.subr.bf16.mxu0 %v5721_v21 }
0x2b66   :  { %5298 = vmatmul.mubr.msk.f32.vlgmr.msra.gmra.mrb[34].mxu0 %vm160_vm2, %v5797_v18  ;;  %v4024_v18 = vld [vmem:[#allocation7 + $0x68] sm:$0xff] }
0x2b67   :  { %5577 = vmatpush3.bf16.msk.msra.mxu0 %vm5576_vm5, %v5722_v22  ;;  %5314 = vmatprep.mubr.msk.f32.mxu0 %vm5723_vm6, %v5724_v23  ;;  %vm4455_vm5 = vcmp.eq.f32.partialorder %v4435_v58, %v6026_v42 }
0x2b68   :  { %4042 = vperm.xlu1 %5620, %v4024_v18  }
0x2b6a   :  { %5315 = vmatmul.mubr.msk.f32.vlgmr.msra.gmra.mrb[36].mxu0 %vm160_vm2, %v4157_v24  ;;  %v4038_v24 = vpop.permute.xlu0 %4037 }
0x2b6b   :  { %5319 = vmatprep.mubr.msk.f32.mxu0 %vm70_vm1, %v4231_v26 }
0x2be7   :  { %v4043_v19 = vpop.permute.xlu1 %4042 }
0x2c39   :  { %v5299_v29 = vpop.f32.mrb[34].mxu0 }
0x2c3a   :  { %v4016_v30 = vmax.f32 %v5299_v29, 0.0  ;;  %v4006_v31 = vpop.f32.mrb[35].mxu0 }
0x2c3b   :  { %v4015_v32 = vmax.f32 %v4006_v31, 0.0 }
0x2c3d   :  { %v5571_v33 = vpack.c.bf16 %v4016_v30, %v4015_v32  ;;  %v4227_v34 = vpop.f32.mrb[36].mxu0  ;;  %v4335_v30 = vld [vmem:[#allocation7 + $0x90] sm:$0xff] }
0x2c3e   :  { %v5316_v36 = vpop.f32.mrb[37].mxu0  ;;  %5317 = vmatprep.subr.msk.mxu0 %vm77_vm0, %v4227_v34 }
0x2c3f   :  { %5572 = vmatprep.subr.bf16.mxu1 %v5571_v33  ;;  %5318 = vmatpush3.msk.msra.mxu0 %vm77_vm0, %v4227_v34  ;;  %vm4452_vm0 = vcmp.eq.f32.partialorder %v4432_v53, %v6026_v42 }
0x2c40   :  { %5574 = vmatpush3.bf16.msra.mxu1 %v5571_v33  ;;  %5320 = vmatmul.mubr.msk.f32.vlgmr.msra.gmra.mrb[38].mxu0 %vm70_vm1, %v4232_v35  ;;  %v4552_v33 = vpop.permute.xlu0 %4551 }
0x2c41   :  { %5322 = vmatprep.mubr.msk.f32.mxu0 %vm70_vm1, %v4233_v37  ;;  %5578 = vmatprep.subr.bf16.mxu1 %v5721_v21 }
0x2c42   :  { %5584 = vmatprep.subr.bf16.mxu0 %v5721_v21 }
0x2c43   :  { %5305 = vmatmul.mubr.msk.f32.vlgmr.msra.gmra.mrb[66].mxu1 %vm160_vm2, %v4018_v38 }
0x2c44   :  { %5307 = vmatprep.mubr.msk.f32.mxu1 %vm160_vm2, %v4019_v39  ;;  %5323 = vmatmul.mubr.msk.f32.gmra.mrb[40].mxu0 %vm70_vm1, %v4234_v40  ;;  %vm4453_vm1 = vcmp.eq.f32.partialorder %v4433_v54, %v6026_v42 }
0x2c45   :  { %5368 = vmatprep.mubr.msk.f32.mxu0 %vm5723_vm6, %v5724_v23  ;;  %vm5594_vm3 = vmpackc.low %vm4453_vm1, %vm4452_vm0  ;;  %vm4340_vm0 = vcmask 261120  }
0x2c46   :  { %5586 = vmatpush3.bf16.xpose.msk.msra.mxu0 %vm5585_vm9, %v5722_v22  ;;  %vm5600_vm9 = vmpackc.low %vm4457_vm8, %vm4456_vm7 }
0x2c47   :  { %5308 = vmatmul.mubr.msk.f32.gmra.mrb[68].mxu1 %vm160_vm2, %v4020_v41  ;;  %5587 = vmatprep.subr.bf16.mxu0 %v5721_v21 }
0x2c48   :  { %5333 = vmatprep.mubr.msk.f32.mxu1 %vm5723_vm6, %v5724_v23  ;;  %vm5597_vm6 = vmpackc.low %vm4455_vm5, %vm4454_vm4 }
0x2c4e   :  { %5589 = vmatpush3.bf16.xpose.msk.msra.mxu0 %vm5588_vm12, %v5722_v22  ;;  %vm5603_vm12 = vmpackc.low %vm4459_vm11, %vm4458_vm10 }
0x2c4f   :  { %5590 = vmatprep.subr.bf16.mxu0 %v5721_v21 }
0x2c56   :  { %5592 = vmatpush3.bf16.xpose.msk.msra.mxu0 %vm5591_vm15, %v5722_v22  ;;  %vm5606_vm15 = vmpackc.low %vm4461_vm14, %vm4460_vm13 }
0x2c57   :  { %5593 = vmatprep.subr.bf16.mxu0 %v5721_v21 }
0x2c5e   :  { %5595 = vmatpush3.bf16.xpose.msk.msra.mxu0 %vm5594_vm3, %v5722_v22 }
0x2c5f   :  { %5596 = vmatprep.subr.bf16.mxu0 %v5721_v21 }
0x2c66   :  { %5598 = vmatpush3.bf16.xpose.msk.msra.mxu0 %vm5597_vm6, %v5722_v22 }
0x2c67   :  { %5599 = vmatprep.subr.bf16.mxu0 %v5721_v21 }
0x2c6e   :  { %5601 = vmatpush3.bf16.xpose.msk.msra.mxu0 %vm5600_vm9, %v5722_v22 }
0x2c6f   :  { %5602 = vmatprep.subr.bf16.mxu0 %v5721_v21 }
0x2c76   :  { %5604 = vmatpush3.bf16.xpose.msk.msra.mxu0 %vm5603_vm12, %v5722_v22 }
0x2c77   :  { %5605 = vmatprep.subr.bf16.mxu0 %v5721_v21 }
0x2c7e   :  { %5607 = vmatpush3.bf16.xpose.msk.msra.mxu0 %vm5606_vm15, %v5722_v22 }
0x2d13   :  { %v5321_v9 = vpop.f32.mrb[38].mxu0 }
0x2d14   :  { %v4316_v12 = vpop.f32.mrb[39].mxu0 }
0x2d16   :  { %v5306_v13 = vpop.f32.mrb[66].mxu1 }
0x2d17   :  { %v4129_v11 = vadd.f32 %v5306_v13, %v4033_v10  ;;  %v4123_v14 = vpop.f32.mrb[67].mxu1  ;;  %v5324_v15 = vpop.f32.mrb[40].mxu0 }
0x2d18   :  { %v4124_v8 = vadd.f32 %v4123_v14, %v4028_v7  ;;  %v4326_v16 = vpop.f32.mrb[41].mxu0 }
0x2d19   :  { %v4337_v17 = vmul.f32 %v5321_v9, %v4129_v11 }
0x2d1a   :  { %v4336_v20 = vmul.f32 %v4316_v12, %v4124_v8  ;;  %v5309_v23 = vpop.f32.mrb[68].mxu1 }
0x2d1b   :  { %v4139_v25 = vadd.f32 %v5309_v23, %v4043_v19  ;;  %v4133_v26 = vpop.f32.mrb[69].mxu1 }
0x2d1c   :  { %v5579_v27 = vpack.c.bf16 %v4337_v17, %v4336_v20  ;;  %v4134_v28 = vadd.f32 %v4133_v26, %v4038_v24 }
0x2d1d   :  { %v4339_v22 = vmul.f32 %v5324_v15, %v4139_v25 }
0x2d1e   :  { %v4338_v18 = vmul.f32 %v4326_v16, %v4134_v28  ;;  %5580 = vmatpush3.bf16.msra.mxu1 %v5579_v27 }
0x2d1f   :  { %5581 = vmatprep.subr.bf16.mxu1 %v5721_v21 }
0x2d20   :  { %v5582_v29 = vpack.c.bf16 %v4339_v22, %v4338_v18 }
0x2d22   :  { %5583 = vmatpush3.bf16.msra.mxu1 %v5582_v29 }
0x2d25   :  { %5334 = vmatmul.mubr.msk.f32.vlgmr.msra.gmra.mrb[70].mxu1 %vm4340_vm0, %v4335_v30 }
0x2df8   :  { %v4410_v31 = vpop.f32.mrb[70].mxu1 }
0x2df9   :  { %v5335_v32 = vpop.f32.mrb[71].mxu1  ;;  %5369 = vmatmul.mubr.f32.vlgmr.msra.gmra.mrb[42].mxu0 %v4410_v31 }
0x2ecc   :  { %v4544_v34 = vpop.f32.mrb[42].mxu0 }
0x2ecd   :  { %v4554_v35 = vadd.f32 %v4552_v33, %v4544_v34  ;;  %v5370_v36 = vpop.f32.mrb[43].mxu0 }
0x2ecf   :  { %4555 = vst.msk [vmem:[#allocation8] sm:$0xff] %vm160_vm2, %v4554_v35 }
0x2ed0   :  { %5698 = shalt.err (!%p5695_p0)
}
0x2ed1   :  { %s5699_s6 = scalar_lea.hbm %s6091_s4, 128 }
0x2ed2   :  { %p5700_p1 = scmp.ne.s32.totalorder %s6091_s4, %s5699_s6  ;;  %p5703_p2 = scmp.lt.u32.totalorder %s5699_s6, %s6091_s4 }
0x2ed4   :  { %p5705_p3 = pnand %p5703_p2, %p5700_p1 }
0x2ed6   :  { %5708 = shalt.err (!%p5705_p3)
}
0x2ed7   :  { %4565 = dma.vmem_to_hbm [thread:$0]  %s4563_s28, 128, %s6091_s4, [#allocation4]  }
0x2ed8   :  { %5713 = dma.done.wait [#allocation4], 128  }
0x2ed9   :  { %5714 = vsyncadd [#allocation4], 4294967168 }
0x2eda   :  { %4569 = vsyncpa [#allocation3], 1 }
0x2edb   :  { %4570 = vsyncpa [#allocation6], 1 }
0x2edc   :  { %4571 = vsyncpa [#allocation4], 1 }

</bundles_post_ra>
